<compile_context>
chip_gen: v6e
topology: v6e:2x2x1
jax: 0.10.0
libtpu: 0.0.40
codegen_flags: <defaults>
</compile_context>

<pallas_src>
import functools

import jax
import jax.numpy as jnp
import numpy as np
from jax.experimental import pallas as pl
from jax.experimental.pallas import tpu as pltpu


# ----------------------------------------------------------------------------- kernel

def gru_model_kernel(x_ref,
                     wih0_ref, whh0_ref, b0_ref, bhn0_ref,
                     wih1_ref, whh1_ref, b1_ref, bhn1_ref,
                     wfc_ref, bfc_ref,
                     out_ref,
                     gi_buf,             # VMEM scratch: (S*Bt, 3*Hp) f32, reused per layer
                     h1_buf,             # VMEM scratch: (S*Bt, Hp) layer-0 outputs
                     *, seq_len):
    S = seq_len
    Bt = x_ref.shape[0] // S             # rows are time-major: row = t*Bt + b
    Hp = whh0_ref.shape[0]               # padded hidden size (multiple of 128)
    mxu_dt = whh0_ref.dtype              # MXU operand dtype (bf16 fast path or f32)

    def run_layer(whh_ref, bhn_ref, store_h):
        """GRU recurrence over gi_buf; gates carry folded (b_ih+b_hh) r/z biases
        and the n-gate b_ih; only b_hh_n is applied per step."""
        whh = whh_ref[...]
        bhn_b = jnp.broadcast_to(bhn_ref[...], (Bt, Hp))       # hoisted broadcast

        def step(t, h):
            row = pl.multiple_of(t * Bt, 8)
            gi = gi_buf[pl.ds(row, Bt), :]                     # (Bt, 3*Hp) f32
            gh = jnp.dot(h.astype(mxu_dt), whh,
                         preferred_element_type=jnp.float32)   # (Bt, 3*Hp)
            # r and z share one sigmoid over a lane-aligned (Bt, 2*Hp) slab.
            rz = jax.nn.sigmoid(gi[:, :2 * Hp] + gh[:, :2 * Hp])
            r = rz[:, :Hp]
            z = rz[:, Hp:]
            n = jnp.tanh(gi[:, 2 * Hp:] + r * (gh[:, 2 * Hp:] + bhn_b))
            h_new = (1.0 - z) * n + z * h
            if store_h:
                h1_buf[pl.ds(row, Bt), :] = h_new.astype(h1_buf.dtype)
            return h_new

        return jax.lax.fori_loop(0, S, step, jnp.zeros((Bt, Hp), jnp.float32))

    # ---- Layer 0: ONE batched input projection for all timesteps ---------------
    gi_buf[...] = (jnp.dot(x_ref[...].astype(mxu_dt), wih0_ref[...],
                           preferred_element_type=jnp.float32) + b0_ref[...])
    run_layer(whh0_ref, bhn0_ref, store_h=True)

    # ---- Layer 1: batched projection over stacked layer-0 outputs (reuse slab) --
    gi_buf[...] = (jnp.dot(h1_buf[...].astype(mxu_dt), wih1_ref[...],
                           preferred_element_type=jnp.float32) + b1_ref[...])
    h2 = run_layer(whh1_ref, bhn1_ref, store_h=False)

    # ---- out = fc(out[:, -1, :]): VPU multiply + lane reduce (no N=1 MXU matmul)
    y = jnp.sum(h2 * wfc_ref[...], axis=-1, keepdims=True) + bfc_ref[...]
    out_ref[...] = y.astype(out_ref.dtype)


# ----------------------------------------------------------------------------- wrapper

def _round_up(x, m):
    return ((x + m - 1) // m) * m


def _choose_blocking(batch, max_block=128):
    """Pad batch to a sublane multiple and pick the batch block Bt (MXU M-tile).
    Prefer >=2 grid blocks so the "parallel" axis can shard across TensorCores."""
    b8 = _round_up(batch, 8)
    bt = min(max_block, b8)
    bp = _round_up(b8, bt)
    nb = bp // bt
    if nb == 1 and bt % 16 == 0:      # split for megacore when still sublane-aligned
        bt //= 2
        nb = 2
    return bp, bt, nb


def gru_model_forward(x, params, *, max_block=128):
    """x: (B, S, I) float32 (batch_first, like PyTorch). params: packed dict."""
    B, S, I = x.shape
    Hp = params["whh0"].shape[0]
    mxu_dtype = params["whh0"].dtype

    Bp, Bt, nb = _choose_blocking(B, max_block)

    # Layer-0 output slab dtype: matmul dtype (halves VMEM, feeds layer-1's MXU
    # projection directly) when every per-step (Bt, Hp) store stays aligned to the
    # packed bf16 (16,128) tile; otherwise keep f32.
    h1_dtype = mxu_dtype
    if jnp.dtype(mxu_dtype).itemsize < 4 and Bt % 16 != 0:
        h1_dtype = jnp.float32

    # Wrapper-side layout plumbing: zero-pad the batch, then per batch block build a
    # time-major (S*Bt, I) slab so in-kernel slices / batched projections are
    # contiguous, aligned rows.
    x_p = jnp.pad(x.astype(jnp.float32), ((0, Bp - B), (0, 0), (0, 0)))
    x2d = x_p.reshape(nb, Bt, S, I).transpose(0, 2, 1, 3).reshape(nb * S * Bt, I)

    def wspec(p):   # weights/biases: whole array, constant block index -> VMEM-resident
        return pl.BlockSpec(p.shape, lambda b: (0, 0))

    in_specs = [
        pl.BlockSpec((S * Bt, I), lambda b: (b, 0)),            # x: one batch block
        wspec(params["wih0"]), wspec(params["whh0"]),
        wspec(params["b0"]), wspec(params["bhn0"]),
        wspec(params["wih1"]), wspec(params["whh1"]),
        wspec(params["b1"]), wspec(params["bhn1"]),
        wspec(params["wfc"]), wspec(params["bfc"]),
    ]
    out_specs = pl.BlockSpec((Bt, 1), lambda b: (b, 0))

    # Explicit VMEM budget from slab math (double-buffered I/O + scratch slabs).
    w_bytes = sum(int(np.prod(p.shape)) * jnp.dtype(p.dtype).itemsize
                  for p in params.values())
    need = (2 * (w_bytes + S * Bt * I * 4 + Bt * 4)
            + S * Bt * 3 * Hp * 4
            + S * Bt * Hp * jnp.dtype(h1_dtype).itemsize)
    vmem_limit = int(min(64 * 2**20, max(4 * need, 16 * 2**20)))

    kernel = functools.partial(gru_model_kernel, seq_len=S)

    out = pl.pallas_call(
        kernel,
        out_shape=jax.ShapeDtypeStruct((Bp, 1), jnp.float32),
        grid=(nb,),
        in_specs=in_specs,
        out_specs=out_specs,
        scratch_shapes=[
            pltpu.VMEM((S * Bt, 3 * Hp), jnp.float32),   # gi slab (both layers)
            pltpu.VMEM((S * Bt, Hp), h1_dtype),          # layer-0 outputs
        ],
        compiler_params=pltpu.CompilerParams(
            dimension_semantics=("parallel",),
            vmem_limit_bytes=vmem_limit),
    )(x2d,
      params["wih0"], params["whh0"], params["b0"], params["bhn0"],
      params["wih1"], params["whh1"], params["b1"], params["bhn1"],
      params["wfc"], params["bfc"])

    return out[:B]


# ----------------------------------------------------------------------------- params

def init_raw_params(key, input_size, hidden_size):
    """PyTorch-layout parameters with uniform(-1/sqrt(H), 1/sqrt(H)) init."""
    H = hidden_size
    bound = 1.0 / np.sqrt(H)
    keys = jax.random.split(key, 10)

    def u(k, shape):
        return jax.random.uniform(k, shape, jnp.float32, -bound, bound)

    return {
        "w_ih0": u(keys[0], (3 * H, input_size)), "w_hh0": u(keys[1], (3 * H, H)),
        "b_ih0": u(keys[2], (3 * H,)),            "b_hh0": u(keys[3], (3 * H,)),
        "w_ih1": u(keys[4], (3 * H, H)),          "w_hh1": u(keys[5], (3 * H, H)),
        "b_ih1": u(keys[6], (3 * H,)),            "b_hh1": u(keys[7], (3 * H,)),
        "fc_w":  u(keys[8], (1, H)),              "fc_b":  u(keys[9], (1,)),
    }


def pack_params(raw, input_size, hidden_size, mxu_dtype=jnp.bfloat16):
    """Transpose + lane-pad PyTorch-layout params for the kernel.

    Each gate is padded to Hp (= ceil(H/128)*128) lanes so gate slices inside the
    kernel are lane-aligned vreg views.  r/z biases (b_ih + b_hh) are folded into
    the batched input-projection bias; the n-gate keeps b_hh_n separate.  Matmul
    weights are stored in `mxu_dtype` (bf16 fast path); biases and fc stay f32."""
    H = hidden_size
    Hp = ((H + 127) // 128) * 128

    def pad_gates(w, rows_padded):
        # w: (3H, rows_real) torch layout -> (rows_padded, 3*Hp), transposed.
        w = np.asarray(w, np.float32)
        rows_real = w.shape[1]
        out = np.zeros((rows_padded, 3 * Hp), np.float32)
        for g in range(3):
            out[:rows_real, g * Hp: g * Hp + H] = w[g * H:(g + 1) * H, :].T
        return jnp.asarray(out, dtype=mxu_dtype)

    def fused_bias(b_ih, b_hh):
        out = np.zeros((1, 3 * Hp), np.float32)
        bi = np.asarray(b_ih, np.float32)
        bh = np.asarray(b_hh, np.float32)
        out[0, 0 * Hp: 0 * Hp + H] = bi[0:H] + bh[0:H]              # r
        out[0, 1 * Hp: 1 * Hp + H] = bi[H:2 * H] + bh[H:2 * H]      # z
        out[0, 2 * Hp: 2 * Hp + H] = bi[2 * H:3 * H]                # n (b_ih only)
        return jnp.asarray(out)

    def pad_bhn(b_hh):
        out = np.zeros((1, Hp), np.float32)
        out[0, :H] = np.asarray(b_hh, np.float32)[2 * H:3 * H]
        return jnp.asarray(out)

    wfc = np.zeros((1, Hp), np.float32)
    wfc[0, :H] = np.asarray(raw["fc_w"], np.float32)[0]
    bfc = np.asarray(raw["fc_b"], np.float32).reshape(1, 1)

    return {
        "wih0": pad_gates(raw["w_ih0"], input_size),
        "whh0": pad_gates(raw["w_hh0"], Hp),
        "b0":   fused_bias(raw["b_ih0"], raw["b_hh0"]),
        "bhn0": pad_bhn(raw["b_hh0"]),
        "wih1": pad_gates(raw["w_ih1"], Hp),
        "whh1": pad_gates(raw["w_hh1"], Hp),
        "b1":   fused_bias(raw["b_ih1"], raw["b_hh1"]),
        "bhn1": pad_bhn(raw["b_hh1"]),
        "wfc":  jnp.asarray(wfc),
        "bfc":  jnp.asarray(bfc),
    }


# ----------------------------------------------------------------------------- reference

def reference_forward(x, raw, hidden_size):
    """Pure-JAX reference of the PyTorch forward pass (unpadded f32 weights)."""
    H = hidden_size
    B, S, _ = x.shape

    def cell(xt, h, w_ih, w_hh, b_ih, b_hh):
        gi = xt @ w_ih.T + b_ih
        gh = h @ w_hh.T + b_hh
        r = jax.nn.sigmoid(gi[:, :H] + gh[:, :H])
        z = jax.nn.sigmoid(gi[:, H:2 * H] + gh[:, H:2 * H])
        n = jnp.tanh(gi[:, 2 * H:] + r * gh[:, 2 * H:])
        return (1.0 - z) * n + z * h

    h1 = jnp.zeros((B, H), jnp.float32)
    h2 = jnp.zeros((B, H), jnp.float32)
    for t in range(S):
        h1 = cell(x[:, t, :], h1, raw["w_ih0"], raw["w_hh0"], raw["b_ih0"], raw["b_hh0"])
        h2 = cell(h1, h2, raw["w_ih1"], raw["w_hh1"], raw["b_ih1"], raw["b_hh1"])
    return h2 @ raw["fc_w"].T + raw["fc_b"]


# ----------------------------------------------------------------------------- main

if __name__ == "__main__":
    batch, seq, input_size, hidden_size = 2, 8, 4, 32

    key = jax.random.PRNGKey(0)
    kx, kp = jax.random.split(key)
    x = jax.random.normal(kx, (batch, seq, input_size), dtype=jnp.float32)

    raw = init_raw_params(kp, input_size, hidden_size)
    ref = reference_forward(x, raw, hidden_size)

    # Exact-semantics path: f32 MXU operands (matches nn.GRU numerics tightly).
    params_f32 = pack_params(raw, input_size, hidden_size, mxu_dtype=jnp.float32)
    out_f32 = jax.block_until_ready(gru_model_forward(x, params_f32))
    assert out_f32.shape == (batch, 1)
    np.testing.assert_allclose(np.asarray(out_f32), np.asarray(ref), rtol=1e-4, atol=1e-5)

    # Fast path: bf16 MXU operands, f32 accumulation, f32 gate math.
    params_bf16 = pack_params(raw, input_size, hidden_size, mxu_dtype=jnp.bfloat16)
    out_bf16 = jax.block_until_ready(gru_model_forward(x, params_bf16))
    assert out_bf16.shape == (batch, 1)
    np.testing.assert_allclose(np.asarray(out_bf16), np.asarray(ref), rtol=5e-2, atol=5e-2)

    print("KERNEL_OK")
</pallas_src>

<mosaic_0001>
module attributes {stable_mosaic.version = 11 : i64} {
  func.func @gru_model_kernel(%arg0: i32, %arg1: memref<64x4xf32, #tpu.memory_space<vmem>>, %arg2: memref<4x384xf32, #tpu.memory_space<vmem>>, %arg3: memref<128x384xf32, #tpu.memory_space<vmem>>, %arg4: memref<1x384xf32, #tpu.memory_space<vmem>>, %arg5: memref<1x128xf32, #tpu.memory_space<vmem>>, %arg6: memref<128x384xf32, #tpu.memory_space<vmem>>, %arg7: memref<128x384xf32, #tpu.memory_space<vmem>>, %arg8: memref<1x384xf32, #tpu.memory_space<vmem>>, %arg9: memref<1x128xf32, #tpu.memory_space<vmem>>, %arg10: memref<1x128xf32, #tpu.memory_space<vmem>>, %arg11: memref<1x1xf32, #tpu.memory_space<vmem>>, %arg12: memref<8x1xf32, #tpu.memory_space<vmem>>, %arg13: memref<64x384xf32, #tpu.memory_space<vmem>>, %arg14: memref<64x128xf32, #tpu.memory_space<vmem>>) attributes {dimension_semantics = [#tpu.dimension_semantics<parallel>], iteration_bounds = array<i64: 1>, scalar_prefetch = 0 : i64, scratch_operands = 2 : i64, tpu.core_type = #tpu.core_type<tc>, window_params = [{transform_indices = @transform_0, window_bounds = array<i64: 64, 4>}, {pipeline_mode = #tpu.pipeline_mode<synchronous>, transform_indices = @transform_1, window_bounds = array<i64: 4, 384>}, {pipeline_mode = #tpu.pipeline_mode<synchronous>, transform_indices = @transform_2, window_bounds = array<i64: 128, 384>}, {pipeline_mode = #tpu.pipeline_mode<synchronous>, transform_indices = @transform_3, window_bounds = array<i64: 1, 384>}, {pipeline_mode = #tpu.pipeline_mode<synchronous>, transform_indices = @transform_4, window_bounds = array<i64: 1, 128>}, {pipeline_mode = #tpu.pipeline_mode<synchronous>, transform_indices = @transform_5, window_bounds = array<i64: 128, 384>}, {pipeline_mode = #tpu.pipeline_mode<synchronous>, transform_indices = @transform_6, window_bounds = array<i64: 128, 384>}, {pipeline_mode = #tpu.pipeline_mode<synchronous>, transform_indices = @transform_7, window_bounds = array<i64: 1, 384>}, {pipeline_mode = #tpu.pipeline_mode<synchronous>, transform_indices = @transform_8, window_bounds = array<i64: 1, 128>}, {pipeline_mode = #tpu.pipeline_mode<synchronous>, transform_indices = @transform_9, window_bounds = array<i64: 1, 128>}, {pipeline_mode = #tpu.pipeline_mode<synchronous>, transform_indices = @transform_10, window_bounds = array<i64: 1, 1>}, {transform_indices = @transform_11, window_bounds = array<i64: 8, 1>}]} {
    %c0 = arith.constant 0 : index
    %c0_0 = arith.constant 0 : index
    %0 = vector.load %arg1[%c0, %c0_0] : memref<64x4xf32, #tpu.memory_space<vmem>>, vector<64x4xf32>
    %c0_1 = arith.constant 0 : index
    %c0_2 = arith.constant 0 : index
    %1 = vector.load %arg2[%c0_1, %c0_2] : memref<4x384xf32, #tpu.memory_space<vmem>>, vector<4x384xf32>
    %cst = arith.constant dense<0.000000e+00> : vector<64x384xf32>
    %2 = tpu.matmul %0, %1, %cst {dimension_numbers = #tpu.dot_dimension_numbers<[1], [0], [0], [1], [0, 0, 1, 1], [], []>} : vector<64x4xf32>, vector<4x384xf32>, vector<64x384xf32> -> vector<64x384xf32>
    %c0_3 = arith.constant 0 : index
    %c0_4 = arith.constant 0 : index
    %3 = vector.load %arg4[%c0_3, %c0_4] : memref<1x384xf32, #tpu.memory_space<vmem>>, vector<1x384xf32>
    %4 = vector.broadcast %3 : vector<1x384xf32> to vector<64x384xf32>
    %5 = arith.addf %2, %4 : vector<64x384xf32>
    %c0_5 = arith.constant 0 : index
    %c0_6 = arith.constant 0 : index
    %6 = vector.load %arg13[%c0_5, %c0_6] : memref<64x384xf32, #tpu.memory_space<vmem>>, vector<64x384xf32>
    tpu.vector_store %arg13[%c0_5, %c0_6], %5 {strides = array<i32>} : memref<64x384xf32, #tpu.memory_space<vmem>>, vector<64x384xf32>,
    %c0_7 = arith.constant 0 : index
    %c0_8 = arith.constant 0 : index
    %7 = vector.load %arg3[%c0_7, %c0_8] : memref<128x384xf32, #tpu.memory_space<vmem>>, vector<128x384xf32>
    %c0_9 = arith.constant 0 : index
    %c0_10 = arith.constant 0 : index
    %8 = vector.load %arg5[%c0_9, %c0_10] : memref<1x128xf32, #tpu.memory_space<vmem>>, vector<1x128xf32>
    %9 = vector.shape_cast %8 : vector<1x128xf32> to vector<1x128xf32>
    %10 = vector.broadcast %9 : vector<1x128xf32> to vector<8x128xf32>
    %cst_11 = arith.constant 0.000000e+00 : f32
    %11 = vector.broadcast %cst_11 : f32 to vector<8x128xf32>
    %c0_i32 = arith.constant 0 : i32
    %c8_i32 = arith.constant 8 : i32
    %12 = arith.addi %c0_i32, %c8_i32 : i32
    %c1_i32 = arith.constant 1 : i32
    %13 = scf.for %arg15 = %c0_i32 to %12 step %c1_i32 iter_args(%arg16 = %11) -> (vector<8x128xf32>)  : i32 {
      %c8_i32_38 = arith.constant 8 : i32
      %37 = arith.muli %arg15, %c8_i32_38 : i32
      %38 = tpu.assume_multiple %37, 8 : i32
      %39 = arith.index_cast %38 : i32 to index
      %c0_39 = arith.constant 0 : index
      %40 = vector.load %arg13[%39, %c0_39] : memref<64x384xf32, #tpu.memory_space<vmem>>, vector<8x384xf32>
      %cst_40 = arith.constant dense<0.000000e+00> : vector<8x384xf32>
      %41 = tpu.matmul %arg16, %7, %cst_40 {dimension_numbers = #tpu.dot_dimension_numbers<[1], [0], [0], [1], [0, 0, 1, 1], [], []>} : vector<8x128xf32>, vector<128x384xf32>, vector<8x384xf32> -> vector<8x384xf32>
      %42 = vector.extract_strided_slice %40 {offsets = [0, 0], sizes = [8, 256], strides = [1, 1]} : vector<8x384xf32> to vector<8x256xf32>
      %43 = vector.extract_strided_slice %41 {offsets = [0, 0], sizes = [8, 256], strides = [1, 1]} : vector<8x384xf32> to vector<8x256xf32>
      %44 = arith.addf %42, %43 : vector<8x256xf32>
      %45 = arith.negf %44 : vector<8x256xf32>
      %46 = math.exp %45 : vector<8x256xf32>
      %cst_41 = arith.constant 1.000000e+00 : f32
      %47 = vector.broadcast %cst_41 : f32 to vector<8x256xf32>
      %48 = arith.addf %47, %46 : vector<8x256xf32>
      %49 = arith.divf %47, %48 : vector<8x256xf32>
      %50 = vector.extract_strided_slice %49 {offsets = [0, 0], sizes = [8, 128], strides = [1, 1]} : vector<8x256xf32> to vector<8x128xf32>
      %51 = vector.extract_strided_slice %49 {offsets = [0, 128], sizes = [8, 128], strides = [1, 1]} : vector<8x256xf32> to vector<8x128xf32>
      %52 = vector.extract_strided_slice %40 {offsets = [0, 256], sizes = [8, 128], strides = [1, 1]} : vector<8x384xf32> to vector<8x128xf32>
      %53 = vector.extract_strided_slice %41 {offsets = [0, 256], sizes = [8, 128], strides = [1, 1]} : vector<8x384xf32> to vector<8x128xf32>
      %54 = arith.addf %53, %10 : vector<8x128xf32>
      %55 = arith.mulf %50, %54 : vector<8x128xf32>
      %56 = arith.addf %52, %55 : vector<8x128xf32>
      %57 = math.tanh %56 : vector<8x128xf32>
      %cst_42 = arith.constant 1.000000e+00 : f32
      %58 = vector.broadcast %cst_42 : f32 to vector<8x128xf32>
      %59 = arith.subf %58, %51 : vector<8x128xf32>
      %60 = arith.mulf %59, %57 : vector<8x128xf32>
      %61 = arith.mulf %51, %arg16 : vector<8x128xf32>
      %62 = arith.addf %60, %61 : vector<8x128xf32>
      %63 = arith.index_cast %38 : i32 to index
      %c0_43 = arith.constant 0 : index
      %64 = vector.load %arg14[%63, %c0_43] : memref<64x128xf32, #tpu.memory_space<vmem>>, vector<8x128xf32>
      tpu.vector_store %arg14[%63, %c0_43], %62 {strides = array<i32>} : memref<64x128xf32, #tpu.memory_space<vmem>>, vector<8x128xf32>,
      scf.yield %62 : vector<8x128xf32>
    }
    %c8_i32_12 = arith.constant 8 : i32
    %c0_13 = arith.constant 0 : index
    %c0_14 = arith.constant 0 : index
    %14 = vector.load %arg14[%c0_13, %c0_14] : memref<64x128xf32, #tpu.memory_space<vmem>>, vector<64x128xf32>
    %c0_15 = arith.constant 0 : index
    %c0_16 = arith.constant 0 : index
    %15 = vector.load %arg6[%c0_15, %c0_16] : memref<128x384xf32, #tpu.memory_space<vmem>>, vector<128x384xf32>
    %cst_17 = arith.constant dense<0.000000e+00> : vector<64x384xf32>
    %16 = tpu.matmul %14, %15, %cst_17 {dimension_numbers = #tpu.dot_dimension_numbers<[1], [0], [0], [1], [0, 0, 1, 1], [], []>} : vector<64x128xf32>, vector<128x384xf32>, vector<64x384xf32> -> vector<64x384xf32>
    %c0_18 = arith.constant 0 : index
    %c0_19 = arith.constant 0 : index
    %17 = vector.load %arg8[%c0_18, %c0_19] : memref<1x384xf32, #tpu.memory_space<vmem>>, vector<1x384xf32>
    %18 = vector.broadcast %17 : vector<1x384xf32> to vector<64x384xf32>
    %19 = arith.addf %16, %18 : vector<64x384xf32>
    %c0_20 = arith.constant 0 : index
    %c0_21 = arith.constant 0 : index
    %20 = vector.load %arg13[%c0_20, %c0_21] : memref<64x384xf32, #tpu.memory_space<vmem>>, vector<64x384xf32>
    tpu.vector_store %arg13[%c0_20, %c0_21], %19 {strides = array<i32>} : memref<64x384xf32, #tpu.memory_space<vmem>>, vector<64x384xf32>,
    %c0_22 = arith.constant 0 : index
    %c0_23 = arith.constant 0 : index
    %21 = vector.load %arg7[%c0_22, %c0_23] : memref<128x384xf32, #tpu.memory_space<vmem>>, vector<128x384xf32>
    %c0_24 = arith.constant 0 : index
    %c0_25 = arith.constant 0 : index
    %22 = vector.load %arg9[%c0_24, %c0_25] : memref<1x128xf32, #tpu.memory_space<vmem>>, vector<1x128xf32>
    %23 = vector.shape_cast %22 : vector<1x128xf32> to vector<1x128xf32>
    %24 = vector.broadcast %23 : vector<1x128xf32> to vector<8x128xf32>
    %cst_26 = arith.constant 0.000000e+00 : f32
    %25 = vector.broadcast %cst_26 : f32 to vector<8x128xf32>
    %c0_i32_27 = arith.constant 0 : i32
    %c8_i32_28 = arith.constant 8 : i32
    %26 = arith.addi %c0_i32_27, %c8_i32_28 : i32
    %c1_i32_29 = arith.constant 1 : i32
    %27 = scf.for %arg15 = %c0_i32_27 to %26 step %c1_i32_29 iter_args(%arg16 = %25) -> (vector<8x128xf32>)  : i32 {
      %c8_i32_38 = arith.constant 8 : i32
      %37 = arith.muli %arg15, %c8_i32_38 : i32
      %38 = tpu.assume_multiple %37, 8 : i32
      %39 = arith.index_cast %38 : i32 to index
      %c0_39 = arith.constant 0 : index
      %40 = vector.load %arg13[%39, %c0_39] : memref<64x384xf32, #tpu.memory_space<vmem>>, vector<8x384xf32>
      %cst_40 = arith.constant dense<0.000000e+00> : vector<8x384xf32>
      %41 = tpu.matmul %arg16, %21, %cst_40 {dimension_numbers = #tpu.dot_dimension_numbers<[1], [0], [0], [1], [0, 0, 1, 1], [], []>} : vector<8x128xf32>, vector<128x384xf32>, vector<8x384xf32> -> vector<8x384xf32>
      %42 = vector.extract_strided_slice %40 {offsets = [0, 0], sizes = [8, 256], strides = [1, 1]} : vector<8x384xf32> to vector<8x256xf32>
      %43 = vector.extract_strided_slice %41 {offsets = [0, 0], sizes = [8, 256], strides = [1, 1]} : vector<8x384xf32> to vector<8x256xf32>
      %44 = arith.addf %42, %43 : vector<8x256xf32>
      %45 = arith.negf %44 : vector<8x256xf32>
      %46 = math.exp %45 : vector<8x256xf32>
      %cst_41 = arith.constant 1.000000e+00 : f32
      %47 = vector.broadcast %cst_41 : f32 to vector<8x256xf32>
      %48 = arith.addf %47, %46 : vector<8x256xf32>
      %49 = arith.divf %47, %48 : vector<8x256xf32>
      %50 = vector.extract_strided_slice %49 {offsets = [0, 0], sizes = [8, 128], strides = [1, 1]} : vector<8x256xf32> to vector<8x128xf32>
      %51 = vector.extract_strided_slice %49 {offsets = [0, 128], sizes = [8, 128], strides = [1, 1]} : vector<8x256xf32> to vector<8x128xf32>
      %52 = vector.extract_strided_slice %40 {offsets = [0, 256], sizes = [8, 128], strides = [1, 1]} : vector<8x384xf32> to vector<8x128xf32>
      %53 = vector.extract_strided_slice %41 {offsets = [0, 256], sizes = [8, 128], strides = [1, 1]} : vector<8x384xf32> to vector<8x128xf32>
      %54 = arith.addf %53, %24 : vector<8x128xf32>
      %55 = arith.mulf %50, %54 : vector<8x128xf32>
      %56 = arith.addf %52, %55 : vector<8x128xf32>
      %57 = math.tanh %56 : vector<8x128xf32>
      %cst_42 = arith.constant 1.000000e+00 : f32
      %58 = vector.broadcast %cst_42 : f32 to vector<8x128xf32>
      %59 = arith.subf %58, %51 : vector<8x128xf32>
      %60 = arith.mulf %59, %57 : vector<8x128xf32>
      %61 = arith.mulf %51, %arg16 : vector<8x128xf32>
      %62 = arith.addf %60, %61 : vector<8x128xf32>
      scf.yield %62 : vector<8x128xf32>
    }
    %c8_i32_30 = arith.constant 8 : i32
    %c0_31 = arith.constant 0 : index
    %c0_32 = arith.constant 0 : index
    %28 = vector.load %arg10[%c0_31, %c0_32] : memref<1x128xf32, #tpu.memory_space<vmem>>, vector<1x128xf32>
    %29 = vector.broadcast %28 : vector<1x128xf32> to vector<8x128xf32>
    %30 = arith.mulf %27, %29 : vector<8x128xf32>
    %cst_33 = arith.constant dense<0.000000e+00> : vector<8xf32>
    %31 = vector.multi_reduction <add>, %30, %cst_33 [1] : vector<8x128xf32> to vector<8xf32>
    %32 = vector.shape_cast %31 : vector<8xf32> to vector<8x1xf32>
    %c0_34 = arith.constant 0 : index
    %c0_35 = arith.constant 0 : index
    %33 = vector.load %arg11[%c0_34, %c0_35] : memref<1x1xf32, #tpu.memory_space<vmem>>, vector<1x1xf32>
    %34 = vector.broadcast %33 : vector<1x1xf32> to vector<8x1xf32>
    %35 = arith.addf %32, %34 : vector<8x1xf32>
    %c0_36 = arith.constant 0 : index
    %c0_37 = arith.constant 0 : index
    %36 = vector.load %arg12[%c0_36, %c0_37] : memref<8x1xf32, #tpu.memory_space<vmem>>, vector<8x1xf32>
    tpu.vector_store %arg12[%c0_36, %c0_37], %35 {strides = array<i32>} : memref<8x1xf32, #tpu.memory_space<vmem>>, vector<8x1xf32>,
    return
  }
  func.func @transform_0(%arg0: i32) -> (i32, i32) {
    %c0_i32 = arith.constant 0 : i32
    %c0_i32_0 = arith.constant 0 : i32
    return %arg0, %c0_i32 : i32, i32
  }
  func.func @transform_1(%arg0: i32) -> (i32, i32) {
    %c0_i32 = arith.constant 0 : i32
    %c0_i32_0 = arith.constant 0 : i32
    %c0_i32_1 = arith.constant 0 : i32
    return %c0_i32, %c0_i32_0 : i32, i32
  }
  func.func @transform_2(%arg0: i32) -> (i32, i32) {
    %c0_i32 = arith.constant 0 : i32
    %c0_i32_0 = arith.constant 0 : i32
    %c0_i32_1 = arith.constant 0 : i32
    return %c0_i32, %c0_i32_0 : i32, i32
  }
  func.func @transform_3(%arg0: i32) -> (i32, i32) {
    %c0_i32 = arith.constant 0 : i32
    %c0_i32_0 = arith.constant 0 : i32
    %c0_i32_1 = arith.constant 0 : i32
    return %c0_i32, %c0_i32_0 : i32, i32
  }
  func.func @transform_4(%arg0: i32) -> (i32, i32) {
    %c0_i32 = arith.constant 0 : i32
    %c0_i32_0 = arith.constant 0 : i32
    %c0_i32_1 = arith.constant 0 : i32
    return %c0_i32, %c0_i32_0 : i32, i32
  }
  func.func @transform_5(%arg0: i32) -> (i32, i32) {
    %c0_i32 = arith.constant 0 : i32
    %c0_i32_0 = arith.constant 0 : i32
    %c0_i32_1 = arith.constant 0 : i32
    return %c0_i32, %c0_i32_0 : i32, i32
  }
  func.func @transform_6(%arg0: i32) -> (i32, i32) {
    %c0_i32 = arith.constant 0 : i32
    %c0_i32_0 = arith.constant 0 : i32
    %c0_i32_1 = arith.constant 0 : i32
    return %c0_i32, %c0_i32_0 : i32, i32
  }
  func.func @transform_7(%arg0: i32) -> (i32, i32) {
    %c0_i32 = arith.constant 0 : i32
    %c0_i32_0 = arith.constant 0 : i32
    %c0_i32_1 = arith.constant 0 : i32
    return %c0_i32, %c0_i32_0 : i32, i32
  }
  func.func @transform_8(%arg0: i32) -> (i32, i32) {
    %c0_i32 = arith.constant 0 : i32
    %c0_i32_0 = arith.constant 0 : i32
    %c0_i32_1 = arith.constant 0 : i32
    return %c0_i32, %c0_i32_0 : i32, i32
  }
  func.func @transform_9(%arg0: i32) -> (i32, i32) {
    %c0_i32 = arith.constant 0 : i32
    %c0_i32_0 = arith.constant 0 : i32
    %c0_i32_1 = arith.constant 0 : i32
    return %c0_i32, %c0_i32_0 : i32, i32
  }
  func.func @transform_10(%arg0: i32) -> (i32, i32) {
    %c0_i32 = arith.constant 0 : i32
    %c0_i32_0 = arith.constant 0 : i32
    %c0_i32_1 = arith.constant 0 : i32
    return %c0_i32, %c0_i32_0 : i32, i32
  }
  func.func @transform_11(%arg0: i32) -> (i32, i32) {
    %c0_i32 = arith.constant 0 : i32
    %c0_i32_0 = arith.constant 0 : i32
    return %arg0, %c0_i32 : i32, i32
  }
}

</mosaic_0001>

<bundles_post_ra>
// kernel: tpu_custom_call.1
= control target key start
LH: loop header
LB: loop body
LE: loop exit
PB: predicated region body
PF: predicated region fallthrough
CT: control target
= control target key end

     0   :  { %s2204_s0 = inlined_call_operand.vmem [shape: f32[64,4], index: 0, kind: input, shape index: {}]   ;;  %s2205_s1 = inlined_call_operand.vmem [shape: f32[4,384], index: 1, kind: input, shape index: {}]   ;;  %s2206_s2 = inlined_call_operand.hbm [shape: f32[128,384], index: 2, kind: input, shape index: {}]   ;;  %s2207_s3 = inlined_call_operand.vmem [shape: f32[1,384], index: 3, kind: input, shape index: {}]   ;;  %s2208_s4 = inlined_call_operand.vmem [shape: f32[1,128], index: 4, kind: input, shape index: {}]   ;;  %s2209_s5 = inlined_call_operand.hbm [shape: f32[128,384], index: 5, kind: input, shape index: {}]   ;;  %s2210_s6 = inlined_call_operand.hbm [shape: f32[128,384], index: 6, kind: input, shape index: {}]   ;;  %s2211_s7 = inlined_call_operand.vmem [shape: f32[1,384], index: 7, kind: input, shape index: {}]   ;;  %s2212_s8 = inlined_call_operand.vmem [shape: f32[1,128], index: 8, kind: input, shape index: {}]   ;;  %s2213_s9 = inlined_call_operand.vmem [shape: f32[1,128], index: 9, kind: input, shape index: {}]   ;;  %s2214_s10 = inlined_call_operand.<no memory space> [shape: f32[1,1], index: 10, kind: input, shape index: {}]   ;;  %s2215_s11 = inlined_call_operand.vmem [shape: f32[8,1], index: 11, kind: output, shape index: {}]  }
   0x1   :  { %v16_v0 = vstv %s2214_s10 }
   0x2   :  { %17 = vst [vmem:[#allocation4] sm:$0x1] %v16_v0 }
   0x3   :  { %18 = vsyncpa [#allocation6], 0 }
   0x4   :  { %19 = vsyncpa [#allocation8], 0  ;;  %s1607_s19 = smov [#allocation7]   ;;  %s1608_s21 = smov [#allocation5]  }
   0x5   :  { %s45_s20 = sshll.u32 %s1607_s19, 4  ;;  %s29_s22 = sshll.u32 %s1608_s21, 4  ;;  %s46_s20 = int_to_ptr.vmem [resolvable:$true] %s45_s20  ;;  %s30_s22 = int_to_ptr.vmem [resolvable:$true] %s29_s22 }
   0x6   :  { %s1519_s23 = scalar_lea.vmem %s46_s20, 6144  ;;  %p1524_p1 = scmp.lt.s32.totalorder %s46_s20, %s46_s20 }
   0x7   :  { %p1520_p0 = scmp.ne.s32.totalorder %s46_s20, %s1519_s23  ;;  %p1525_p2 = scmp.lt.s32.totalorder %s1519_s23, %s1519_s23 }
   0x9   :  { %p1526_p3 = por %p1525_p2, %p1524_p1 }
   0xb   :  { %p1527_p4 = pnand %p1526_p3, %p1520_p0 }
   0xd   :  { %1530 = shalt.err (!%p1527_p4)
}
   0xe   :  { %s1609_s24 = smov 384   ;;  %s1610_s25 = smov 24  }
   0xf   :  { %51 = dma.hbm_to_vmem [thread:$0]  %s2209_s5, 6144, %s46_s20, [#allocation8], %s1609_s24, %s1609_s24, %s1610_s25  }
  0x10   :  { %s1539_s27 = scalar_lea.vmem %s30_s22, 6144  ;;  %p1544_p6 = scmp.lt.s32.totalorder %s30_s22, %s30_s22 }
  0x11   :  { %p1540_p5 = scmp.ne.s32.totalorder %s30_s22, %s1539_s27  ;;  %p1545_p7 = scmp.lt.s32.totalorder %s1539_s27, %s1539_s27 }
  0x13   :  { %p1546_p8 = por %p1545_p7, %p1544_p6 }
  0x15   :  { %p1547_p9 = pnand %p1546_p8, %p1540_p5 }
  0x17   :  { %1550 = shalt.err (!%p1547_p9)
}
  0x18   :  { %35 = dma.hbm_to_vmem [thread:$0]  %s2206_s2, 6144, %s30_s22, [#allocation6], %s1609_s24, %s1609_s24, %s1610_s25  }
  0x19   :  { %s1611_s30 = smov [#allocation9]  }
  0x1a   :  { %s57_s12 = sshll.u32 %s1611_s30, 4  ;;  %s58_s12 = int_to_ptr.vmem [resolvable:$true] %s57_s12 }
  0x1b   :  { %s1559_s13 = scalar_lea.vmem %s58_s12, 6144  ;;  %p1564_p11 = scmp.lt.s32.totalorder %s58_s12, %s58_s12 }
  0x1c   :  { %p1560_p10 = scmp.ne.s32.totalorder %s58_s12, %s1559_s13  ;;  %p1565_p12 = scmp.lt.s32.totalorder %s1559_s13, %s1559_s13 }
  0x1e   :  { %p1566_p13 = por %p1565_p12, %p1564_p11 }
  0x20   :  { %p1567_p0 = pnand %p1566_p13, %p1560_p10 }
  0x22   :  { %1570 = shalt.err (!%p1567_p0)
}
  0x23   :  { %63 = dma.hbm_to_vmem [thread:$0]  %s2210_s6, 6144, %s58_s12, [#allocation8], %s1609_s24, %s1609_s24, %s1610_s25  }
  0x24   :  { %1587 = dma.done.wait [#allocation6], 6144  }
  0x25   :  { %1588 = vsyncadd [#allocation6], 4294961152 }
  0x26   :  { %1589 = dma.done.wait [#allocation8], 12288  }
  0x27   :  { %1590 = vsyncadd [#allocation8], 4294955008  ;;  %v2217_v1 = vmov 0.0   ;;  %v1691_v2 = vld [vmem:[#allocation5] sm:$0xff]  ;;  %v1693_v3 = vld [vmem:[#allocation5 + $0x8] sm:$0xff]  ;;  %vm136_vm0 = vcmask 1043456   ;;  %v93_v62 = vlaneseq }
  0x28   :  { %207 = vmatprep.mubr.f32.mxu0 %v2217_v1  ;;  %243 = vmatprep.mubr.f32.mxu1 %v2217_v1  ;;  %2223 = vst [vmem:[#allocation12_spill] sm:$0xff] %v1691_v2  ;;  %v1695_v4 = vld [vmem:[#allocation5 + $0x10] sm:$0xff]  ;;  %v1697_v5 = vld [vmem:[#allocation5 + $0x18] sm:$0xff]  ;;  %v1699_v6 = vld [vmem:[#allocation5 + $0x20] sm:$0xff]  ;;  %vm111_vm1 = vcmask 31744  }
  0x29   :  { %2224 = vst [vmem:[#allocation13_spill] sm:$0xff] %v1695_v4  ;;  %v1701_v7 = vld [vmem:[#allocation5 + $0x28] sm:$0xff]  ;;  %v1703_v8 = vld [vmem:[#allocation5 + $0x30] sm:$0xff]  ;;  %v1705_v9 = vld [vmem:[#allocation5 + $0x38] sm:$0xff]  ;;  %v1850_v63 = vshrl.u32 %v93_v62, 7 }
  0x2a   :  { %2225 = vst [vmem:[#allocation14_spill] sm:$0xff] %v1701_v7  ;;  %v1707_v10 = vld [vmem:[#allocation5 + $0x40] sm:$0xff]  ;;  %v1709_v11 = vld [vmem:[#allocation5 + $0x48] sm:$0xff]  ;;  %v1711_v12 = vld [vmem:[#allocation5 + $0x50] sm:$0xff] }
  0x2b   :  { %v1713_v13 = vld [vmem:[#allocation5 + $0x58] sm:$0xff]  ;;  %v1715_v14 = vld [vmem:[#allocation5 + $0x60] sm:$0xff]  ;;  %v1717_v15 = vld [vmem:[#allocation5 + $0x68] sm:$0xff]  ;;  %2227 = vst [vmem:[#allocation16_spill] sm:$0xff] %v1850_v63  ;;  %v2216_v0 = vsub.s32 0, %v1850_v63 }
  0x2c   :  { %v1719_v16 = vld [vmem:[#allocation5 + $0x70] sm:$0xff]  ;;  %v1721_v17 = vld [vmem:[#allocation5 + $0x78] sm:$0xff]  ;;  %v1723_v18 = vld [vmem:[#allocation5 + $0x80] sm:$0xff] }
  0x2d   :  { %v1725_v19 = vld [vmem:[#allocation5 + $0x88] sm:$0xff]  ;;  %v1727_v20 = vld [vmem:[#allocation5 + $0x90] sm:$0xff]  ;;  %v1729_v21 = vld [vmem:[#allocation5 + $0x98] sm:$0xff] }
  0x2e   :  { %v1731_v22 = vld [vmem:[#allocation5 + $0xa0] sm:$0xff]  ;;  %v1733_v23 = vld [vmem:[#allocation5 + $0xa8] sm:$0xff]  ;;  %v1735_v24 = vld [vmem:[#allocation5 + $0xb0] sm:$0xff] }
  0x2f   :  { %v1737_v25 = vld [vmem:[#allocation5 + $0xb8] sm:$0xff]  ;;  %v1739_v26 = vld [vmem:[#allocation5 + $0xc0] sm:$0xff]  ;;  %v1741_v27 = vld [vmem:[#allocation5 + $0xc8] sm:$0xff] }
  0x30   :  { %v1743_v28 = vld [vmem:[#allocation5 + $0xd0] sm:$0xff]  ;;  %v1745_v29 = vld [vmem:[#allocation5 + $0xd8] sm:$0xff]  ;;  %v1747_v30 = vld [vmem:[#allocation5 + $0xe0] sm:$0xff] }
  0x31   :  { %v1749_v31 = vld [vmem:[#allocation5 + $0xe8] sm:$0xff]  ;;  %v1751_v32 = vld [vmem:[#allocation5 + $0xf0] sm:$0xff]  ;;  %v1753_v33 = vld [vmem:[#allocation5 + $0xf8] sm:$0xff] }
  0x32   :  { %v1755_v34 = vld [vmem:[#allocation5 + $0x100] sm:$0xff]  ;;  %v1757_v35 = vld [vmem:[#allocation5 + $0x108] sm:$0xff]  ;;  %v1759_v36 = vld [vmem:[#allocation5 + $0x110] sm:$0xff] }
  0x33   :  { %v1761_v37 = vld [vmem:[#allocation5 + $0x118] sm:$0xff]  ;;  %v1763_v38 = vld [vmem:[#allocation5 + $0x120] sm:$0xff]  ;;  %v1765_v39 = vld [vmem:[#allocation5 + $0x128] sm:$0xff] }
  0x34   :  { %v1767_v40 = vld [vmem:[#allocation5 + $0x130] sm:$0xff]  ;;  %v1769_v41 = vld [vmem:[#allocation5 + $0x138] sm:$0xff]  ;;  %v1771_v42 = vld [vmem:[#allocation5 + $0x140] sm:$0xff] }
  0x35   :  { %v1773_v43 = vld [vmem:[#allocation5 + $0x148] sm:$0xff]  ;;  %v1775_v44 = vld [vmem:[#allocation5 + $0x150] sm:$0xff]  ;;  %v1777_v45 = vld [vmem:[#allocation5 + $0x158] sm:$0xff] }
  0x36   :  { %v1779_v46 = vld [vmem:[#allocation5 + $0x160] sm:$0xff]  ;;  %v1781_v47 = vld [vmem:[#allocation5 + $0x168] sm:$0xff]  ;;  %v1783_v48 = vld [vmem:[#allocation5 + $0x170] sm:$0xff] }
  0x37   :  { %v1785_v49 = vld [vmem:[#allocation5 + $0x178] sm:$0xff]  ;;  %v87_v54 = vld [vmem:[%s2204_s0 + $0x30] sm:$0xff]  ;;  %v90_v55 = vld [vmem:[%s2205_s1 + $0x8] sm:$0xf] }
  0x38   :  { %v1790_v50 = vld [vmem:[%s2208_s4] ss:$0 sm:$0xff]  ;;  %v82_v56 = vld [vmem:[%s2204_s0 + $0x8] sm:$0xff]  ;;  %v88_v57 = vld [vmem:[%s2204_s0 + $0x38] sm:$0xff] }
  0x39   :  { %2226 = vst [vmem:[#allocation15_spill] sm:$0xff] %v1790_v50  ;;  %v89_v51 = vld [vmem:[%s2205_s1] sm:$0xff]  ;;  %v83_v58 = vld [vmem:[%s2204_s0 + $0x10] sm:$0xff]  ;;  %v84_v59 = vld [vmem:[%s2204_s0 + $0x18] sm:$0xff] }
  0x3a   :  { %v110_v52 = vcombine.high %v89_v51, %v89_v51  ;;  %v81_v53 = vld [vmem:[%s2204_s0] sm:$0xff]  ;;  %v86_v61 = vld [vmem:[%s2204_s0 + $0x28] sm:$0xff] }
  0x3b   :  { %v85_v60 = vld [vmem:[%s2204_s0 + $0x20] sm:$0xff]  ;;  %s1886_s0 = smov 0  }
  0x3c   :  { %1218 = vmatprep.subr.msk.mxu0 %vm136_vm0, %v110_v52  ;;  %1446 = vmatprep.subr.msk.mxu1 %vm136_vm0, %v110_v52  ;;  %v2219_v52 = vsub.s32 1, %v1850_v63 }
  0x3d   :  { %1219 = vmatpush1.msk.msra.mxu0 %vm136_vm0, %v89_v51  ;;  %1447 = vmatpush1.msk.msra.mxu1 %vm136_vm0, %v89_v51  ;;  %v91_v51 = vld [vmem:[%s2207_s3] sm:$0x7] }
  0x3e   :  { %1220 = vmatmul.mubr.msk.f32.vlgmr.msra.gmra.mxu0 %vm111_vm1, %v81_v53  ;;  %1226 = vmatmul.mubr.msk.f32.vlgmr.msra.gmra.mxu1 %vm111_vm1, %v87_v54 }
  0x3f   :  { %1318 = vmatprep.subr.msk.mxu1 %vm136_vm0, %v90_v55  ;;  %213 = vmatprep.mubr.f32.mxu0 %v2217_v1 }
  0x40   :  { %1319 = vmatpush3.msk.msra.mxu1 %vm136_vm0, %v90_v55  ;;  %249 = vmatprep.mubr.f32.mxu1 %v2217_v1 }
  0x42   :  { %1221 = vmatmul.mubr.msk.f32.gmra.mxu0 %vm111_vm1, %v82_v56  ;;  %1227 = vmatmul.mubr.msk.f32.gmra.mxu1 %vm111_vm1, %v88_v57 }
  0x43   :  { %219 = vmatprep.mubr.f32.mxu0 %v2217_v1  ;;  %1320 = vmatprep.mubr.msk.f32.mxu1 %vm111_vm1, %v81_v53  ;;  %v1859_v53 = vrot.slane %v91_v51, %v2216_v0 }
  0x46   :  { %1222 = vmatmul.mubr.msk.f32.gmra.mxu0 %vm111_vm1, %v83_v58  ;;  %1321 = vmatmul.mubr.msk.f32.vlgmr.msra.gmra.mxu1 %vm111_vm1, %v82_v56 }
  0x47   :  { %225 = vmatprep.mubr.f32.mxu0 %v2217_v1  ;;  %1323 = vmatprep.mubr.msk.f32.mxu1 %vm111_vm1, %v83_v58 }
  0x4a   :  { %1223 = vmatmul.mubr.msk.f32.gmra.mxu0 %vm111_vm1, %v84_v59  ;;  %1324 = vmatmul.mubr.msk.f32.gmra.mxu1 %vm111_vm1, %v84_v59  ;;  %v2220_v59 = vsub.s32 2, %v1850_v63 }
  0x4b   :  { %231 = vmatprep.mubr.f32.mxu0 %v2217_v1  ;;  %1326 = vmatprep.mubr.msk.f32.mxu1 %vm111_vm1, %v85_v60 }
  0x4e   :  { %1224 = vmatmul.mubr.msk.f32.gmra.mxu0 %vm111_vm1, %v85_v60  ;;  %1327 = vmatmul.mubr.msk.f32.gmra.mxu1 %vm111_vm1, %v86_v61 }
  0x4f   :  { %237 = vmatprep.mubr.f32.mxu0 %v2217_v1  ;;  %1329 = vmatprep.mubr.msk.f32.mxu1 %vm111_vm1, %v87_v54  ;;  %v1863_v54 = vrot.slane %v91_v51, %v2219_v52 }
  0x52   :  { %1225 = vmatmul.mubr.msk.f32.gmra.mxu0 %vm111_vm1, %v86_v61  ;;  %1330 = vmatmul.mubr.msk.f32.gmra.mxu1 %vm111_vm1, %v88_v57 }
  0xfe   :  { %v209_v55 = vpop.f32.mrf.mxu0  ;;  %v245_v56 = vpop.f32.mrf.mxu1 }
  0xff   :  { %v210_v57 = vadd.f32 %v209_v55, %v1859_v53  ;;  %v246_v58 = vadd.f32 %v245_v56, %v1859_v53  ;;  %v104_v56 = vrot.slane %v91_v51, %v2220_v59 }
 0x100   :  { %v211_v60 = vpop.f32.mrf.mxu0  ;;  %v247_v61 = vpop.f32.mrf.mxu1 }
 0x101   :  { %361 = vst [vmem:[#allocation2] sm:$0xff] %v210_v57  ;;  %379 = vst [vmem:[#allocation2 + $0x90] sm:$0xff] %v246_v58  ;;  %v212_v62 = vadd.f32 %v211_v60, %v1863_v54  ;;  %v248_v0 = vadd.f32 %v247_v61, %v1863_v54 }
 0x102   :  { %v215_v1 = vpop.f32.mrf.mxu0  ;;  %v251_v50 = vpop.f32.mrf.mxu1 }
 0x103   :  { %362 = vst [vmem:[#allocation2 + $0x8] sm:$0xff] %v212_v62  ;;  %380 = vst [vmem:[#allocation2 + $0x98] sm:$0xff] %v248_v0  ;;  %v216_v52 = vadd.f32 %v215_v1, %v1859_v53  ;;  %v252_v55 = vadd.f32 %v251_v50, %v1859_v53 }
 0x104   :  { %v217_v4 = vpop.f32.mrf.mxu0  ;;  %v253_v7 = vpop.f32.mrf.mxu1 }
 0x105   :  { %364 = vst [vmem:[#allocation2 + $0x18] sm:$0xff] %v216_v52  ;;  %382 = vst [vmem:[#allocation2 + $0xa8] sm:$0xff] %v252_v55  ;;  %v218_v57 = vadd.f32 %v217_v4, %v1863_v54  ;;  %v254_v58 = vadd.f32 %v253_v7, %v1863_v54 }
 0x106   :  { %v221_v60 = vpop.f32.mrf.mxu0  ;;  %v1322_v61 = vpop.f32.mrf.mxu1 }
 0x107   :  { %365 = vst [vmem:[#allocation2 + $0x20] sm:$0xff] %v218_v57  ;;  %383 = vst [vmem:[#allocation2 + $0xb0] sm:$0xff] %v254_v58  ;;  %v222_v0 = vadd.f32 %v221_v60, %v1859_v53  ;;  %v328_v1 = vadd.f32 %v1322_v61, %v104_v56 }
 0x108   :  { %v223_v62 = vpop.f32.mrf.mxu0  ;;  %v322_v50 = vpop.f32.mrf.mxu1 }
 0x109   :  { %367 = vst [vmem:[#allocation2 + $0x30] sm:$0xff] %v222_v0  ;;  %366 = vst [vmem:[#allocation2 + $0x28] sm:$0xff] %v328_v1  ;;  %v224_v51 = vadd.f32 %v223_v62, %v1863_v54  ;;  %v323_v59 = vadd.f32 %v322_v50, %v104_v56 }
 0x10a   :  { %v227_v52 = vpop.f32.mrf.mxu0  ;;  %v1325_v55 = vpop.f32.mrf.mxu1 }
 0x10b   :  { %368 = vst [vmem:[#allocation2 + $0x38] sm:$0xff] %v224_v51  ;;  %363 = vst [vmem:[#allocation2 + $0x10] sm:$0xff] %v323_v59  ;;  %v228_v4 = vadd.f32 %v227_v52, %v1859_v53  ;;  %v338_v7 = vadd.f32 %v1325_v55, %v104_v56 }
 0x10c   :  { %v229_v63 = vpop.f32.mrf.mxu0  ;;  %v332_v57 = vpop.f32.mrf.mxu1 }
 0x10d   :  { %370 = vst [vmem:[#allocation2 + $0x48] sm:$0xff] %v228_v4  ;;  %372 = vst [vmem:[#allocation2 + $0x58] sm:$0xff] %v338_v7  ;;  %v230_v58 = vadd.f32 %v229_v63, %v1863_v54  ;;  %v333_v60 = vadd.f32 %v332_v57, %v104_v56 }
 0x10e   :  { %v233_v61 = vpop.f32.mrf.mxu0  ;;  %v1328_v0 = vpop.f32.mrf.mxu1 }
 0x10f   :  { %371 = vst [vmem:[#allocation2 + $0x50] sm:$0xff] %v230_v58  ;;  %369 = vst [vmem:[#allocation2 + $0x40] sm:$0xff] %v333_v60  ;;  %v234_v1 = vadd.f32 %v233_v61, %v1859_v53  ;;  %v348_v62 = vadd.f32 %v1328_v0, %v104_v56  ;;  %v1884_v0 = vmov 0.0  }
 0x110   :  { %v235_v50 = vpop.f32.mrf.mxu0  ;;  %v342_v51 = vpop.f32.mrf.mxu1 }
 0x111   :  { %373 = vst [vmem:[#allocation2 + $0x60] sm:$0xff] %v234_v1  ;;  %378 = vst [vmem:[#allocation2 + $0x88] sm:$0xff] %v348_v62  ;;  %v236_v59 = vadd.f32 %v235_v50, %v1863_v54  ;;  %v343_v52 = vadd.f32 %v342_v51, %v104_v56 }
 0x112   :  { %v239_v55 = vpop.f32.mrf.mxu0  ;;  %v1331_v4 = vpop.f32.mrf.mxu1 }
 0x113   :  { %374 = vst [vmem:[#allocation2 + $0x68] sm:$0xff] %v236_v59  ;;  %375 = vst [vmem:[#allocation2 + $0x70] sm:$0xff] %v343_v52  ;;  %v240_v63 = vadd.f32 %v239_v55, %v1859_v53  ;;  %v358_v7 = vadd.f32 %v1331_v4, %v104_v56 }
 0x114   :  { %v241_v57 = vpop.f32.mrf.mxu0  ;;  %v352_v58 = vpop.f32.mrf.mxu1 }
 0x115   :  { %376 = vst [vmem:[#allocation2 + $0x78] sm:$0xff] %v240_v63  ;;  %384 = vst [vmem:[#allocation2 + $0xb8] sm:$0xff] %v358_v7  ;;  %v242_v60 = vadd.f32 %v241_v57, %v1863_v54  ;;  %v353_v61 = vadd.f32 %v352_v58, %v104_v56 }
 0x117   :  { %377 = vst [vmem:[#allocation2 + $0x80] sm:$0xff] %v242_v60  ;;  %381 = vst [vmem:[#allocation2 + $0xa0] sm:$0xff] %v353_v61 }
 0x118 LB: > { %456 = vmatprep.subr.mxu0 %v1783_v48  ;;  %v1613_v53 = vmov 0.0   ;;  %v2228_v2 = vld [vmem:[#allocation12_spill] sm:$0xff]  ;;  %v2229_v54 = vld [vmem:[#allocation14_spill] sm:$0xff]  ;;  %v2230_v56 = vld [vmem:[#allocation13_spill] sm:$0xff]  ;;  %vm1614_vm2 = vmmov 0   ;;  %s1238_s3 = sshll.u32 %s1597_s0, 3  ;;  %s1597_s0 = sphi %s1886_s0, %s445_s0   ;;  %v1593_v0 = vphi %v1884_v0, %v618_v0  }
 0x119   : > { %457 = vmatpush1.msra.mxu0 %v1781_v47  ;;  %1332 = vmatprep.subr.mxu1 %v1613_v53  ;;  %s448_s14 = sshra.s32 %s1238_s3, 3  ;;  %s619_s15 = scalar_lea.vmem [#allocation3], %s1238_s3 }
 0x11a   : > { %458 = vmatprep.subr.mxu0 %v1777_v45  ;;  %520 = vmatprep.mubr.f32.mxu0 %v1613_v53  ;;  %s1249_s2 = smul.u32 24, %s448_s14  ;;  %s445_s0 = sadd.s32 1, %s1597_s0  }
 0x11b   : > { %459 = vmatpush1.msra.mxu0 %v1775_v44  ;;  %1333 = vmatpush3.msra.mxu1 %v1785_v49  ;;  %p442_p1 = scmp.ge.s32.totalorder %s445_s0, 8  }
 0x11c   : > { %460 = vmatprep.subr.mxu0 %v1771_v42  ;;  %1334 = vmatprep.subr.mxu1 %v1613_v53  ;;  %s452_s6 = scalar_lea.vmem [#allocation2], %s1249_s2  ;;  %v631_v42 = vld [vmem:[#allocation7 + $0x10] sm:$0xff] (%p442_p1) }
 0x11d   : > { %461 = vmatpush1.msra.mxu0 %v1769_v41  ;;  %1335 = vmatpush3.msra.mxu1 %v1779_v46  ;;  %v634_v41 = vld [vmem:[#allocation7 + $0x28] sm:$0xff] (%p442_p1) }
 0x11e   : > { %462 = vmatprep.subr.mxu0 %v1765_v39  ;;  %1336 = vmatprep.subr.mxu1 %v1613_v53  ;;  %v453_v1 = vld [vmem:[%s452_s6] sm:$0xff]  ;;  %v454_v52 = vld [vmem:[%s452_s6 + $0x8] sm:$0xff] }
 0x11f   : > { %463 = vmatpush1.msra.mxu0 %v1763_v38  ;;  %1337 = vmatpush3.msra.mxu1 %v1773_v43  ;;  %v629_v38 = vld [vmem:[#allocation7] sm:$0xff] (%p442_p1) }
 0x120   : > { %464 = vmatprep.subr.mxu0 %v1759_v36  ;;  %1338 = vmatprep.subr.mxu1 %v1613_v53  ;;  %v640_v36 = vld [vmem:[#allocation7 + $0x58] sm:$0xff] (%p442_p1)  ;;  %v637_v39 = vld [vmem:[#allocation7 + $0x40] sm:$0xff] (%p442_p1) }
 0x121   : > { %465 = vmatpush1.msra.mxu0 %v1757_v35  ;;  %1339 = vmatpush3.msra.mxu1 %v1767_v40  ;;  %v632_v35 = vld [vmem:[#allocation7 + $0x18] sm:$0xff] (%p442_p1) }
 0x122   : > { %466 = vmatprep.subr.mxu0 %v1753_v33  ;;  %1340 = vmatprep.subr.mxu1 %v1613_v53  ;;  %v643_v33 = vld [vmem:[#allocation7 + $0x70] sm:$0xff] (%p442_p1) }
 0x123   : > { %467 = vmatpush1.msra.mxu0 %v1751_v32  ;;  %1341 = vmatpush3.msra.mxu1 %v1761_v37  ;;  %v635_v32 = vld [vmem:[#allocation7 + $0x30] sm:$0xff] (%p442_p1)  ;;  %v630_v37 = vld [vmem:[#allocation7 + $0x8] sm:$0xff] (%p442_p1) }
 0x124   : > { %468 = vmatprep.subr.mxu0 %v1747_v30  ;;  %1342 = vmatprep.subr.mxu1 %v1613_v53  ;;  %v646_v30 = vld [vmem:[#allocation7 + $0x88] sm:$0xff] (%p442_p1) }
 0x125   : > { %469 = vmatpush1.msra.mxu0 %v1745_v29  ;;  %1343 = vmatpush3.msra.mxu1 %v1755_v34  ;;  %v638_v29 = vld [vmem:[#allocation7 + $0x48] sm:$0xff] (%p442_p1)  ;;  %v633_v34 = vld [vmem:[#allocation7 + $0x20] sm:$0xff] (%p442_p1) }
 0x126   : > { %470 = vmatprep.subr.mxu0 %v1741_v27  ;;  %1344 = vmatprep.subr.mxu1 %v1613_v53  ;;  %v649_v27 = vld [vmem:[#allocation7 + $0xa0] sm:$0xff] (%p442_p1) }
 0x127   : > { %471 = vmatpush1.msra.mxu0 %v1739_v26  ;;  %1345 = vmatpush3.msra.mxu1 %v1749_v31  ;;  %v641_v26 = vld [vmem:[#allocation7 + $0x60] sm:$0xff] (%p442_p1)  ;;  %v636_v31 = vld [vmem:[#allocation7 + $0x38] sm:$0xff] (%p442_p1) }
 0x128   : > { %472 = vmatprep.subr.mxu0 %v1735_v24  ;;  %1346 = vmatprep.subr.mxu1 %v1613_v53  ;;  %v652_v24 = vld [vmem:[#allocation7 + $0xb8] sm:$0xff] (%p442_p1) }
 0x129   : > { %473 = vmatpush1.msra.mxu0 %v1733_v23  ;;  %1347 = vmatpush3.msra.mxu1 %v1743_v28  ;;  %v644_v23 = vld [vmem:[#allocation7 + $0x78] sm:$0xff] (%p442_p1)  ;;  %v639_v28 = vld [vmem:[#allocation7 + $0x50] sm:$0xff] (%p442_p1) }
 0x12a   : > { %474 = vmatprep.subr.mxu0 %v1729_v21  ;;  %1348 = vmatprep.subr.mxu1 %v1613_v53  ;;  %v655_v21 = vld [vmem:[#allocation7 + $0xd0] sm:$0xff] (%p442_p1) }
 0x12b   : > { %475 = vmatpush1.msra.mxu0 %v1727_v20  ;;  %1349 = vmatpush3.msra.mxu1 %v1737_v25  ;;  %v647_v20 = vld [vmem:[#allocation7 + $0x90] sm:$0xff] (%p442_p1)  ;;  %v642_v25 = vld [vmem:[#allocation7 + $0x68] sm:$0xff] (%p442_p1) }
 0x12c   : > { %476 = vmatprep.subr.mxu0 %v1723_v18  ;;  %1350 = vmatprep.subr.mxu1 %v1613_v53  ;;  %v658_v18 = vld [vmem:[#allocation7 + $0xe8] sm:$0xff] (%p442_p1) }
 0x12d   : > { %477 = vmatpush1.msra.mxu0 %v1721_v17  ;;  %1351 = vmatpush3.msra.mxu1 %v1731_v22  ;;  %v650_v17 = vld [vmem:[#allocation7 + $0xa8] sm:$0xff] (%p442_p1)  ;;  %v645_v22 = vld [vmem:[#allocation7 + $0x80] sm:$0xff] (%p442_p1) }
 0x12e   : > { %478 = vmatprep.subr.mxu0 %v1717_v15  ;;  %1352 = vmatprep.subr.mxu1 %v1613_v53  ;;  %v661_v15 = vld [vmem:[#allocation7 + $0x100] sm:$0xff] (%p442_p1) }
 0x12f   : > { %479 = vmatpush1.msra.mxu0 %v1715_v14  ;;  %1353 = vmatpush3.msra.mxu1 %v1725_v19  ;;  %v653_v14 = vld [vmem:[#allocation7 + $0xc0] sm:$0xff] (%p442_p1)  ;;  %v648_v19 = vld [vmem:[#allocation7 + $0x98] sm:$0xff] (%p442_p1) }
 0x130   : > { %480 = vmatprep.subr.mxu0 %v1711_v12  ;;  %1354 = vmatprep.subr.mxu1 %v1613_v53  ;;  %v664_v12 = vld [vmem:[#allocation7 + $0x118] sm:$0xff] (%p442_p1) }
 0x131   : > { %481 = vmatpush1.msra.mxu0 %v1709_v11  ;;  %1355 = vmatpush3.msra.mxu1 %v1719_v16  ;;  %v656_v11 = vld [vmem:[#allocation7 + $0xd8] sm:$0xff] (%p442_p1)  ;;  %v651_v16 = vld [vmem:[#allocation7 + $0xb0] sm:$0xff] (%p442_p1) }
 0x132   : > { %482 = vmatprep.subr.mxu0 %v1705_v9  ;;  %1356 = vmatprep.subr.mxu1 %v1613_v53  ;;  %v667_v9 = vld [vmem:[#allocation7 + $0x130] sm:$0xff] (%p442_p1) }
 0x133   : > { %483 = vmatpush1.msra.mxu0 %v1703_v8  ;;  %1357 = vmatpush3.msra.mxu1 %v1713_v13  ;;  %v659_v8 = vld [vmem:[#allocation7 + $0xf0] sm:$0xff] (%p442_p1)  ;;  %v654_v13 = vld [vmem:[#allocation7 + $0xc8] sm:$0xff] (%p442_p1) }
 0x134   : > { %484 = vmatprep.subr.mxu0 %v1699_v6  ;;  %1358 = vmatprep.subr.mxu1 %v1613_v53  ;;  %v660_v6 = vld [vmem:[#allocation7 + $0xf8] sm:$0xff] (%p442_p1) }
 0x135   : > { %485 = vmatpush1.msra.mxu0 %v1697_v5  ;;  %1359 = vmatpush3.msra.mxu1 %v1707_v10  ;;  %v670_v5 = vld [vmem:[#allocation7 + $0x148] sm:$0xff] (%p442_p1)  ;;  %v657_v10 = vld [vmem:[#allocation7 + $0xe0] sm:$0xff] (%p442_p1) }
 0x136   : > { %486 = vmatprep.subr.mxu0 %v1693_v3  ;;  %1360 = vmatprep.subr.mxu1 %v1613_v53  ;;  %v662_v3 = vld [vmem:[#allocation7 + $0x108] sm:$0xff] (%p442_p1) }
 0x137   : > { %487 = vmatpush1.msra.mxu0 %v2228_v2  ;;  %1361 = vmatpush3.msra.mxu1 %v2229_v54  ;;  %v455_v2 = vld [vmem:[%s452_s6 + $0x10] sm:$0xff] }
 0x138   : > { %521 = vmatmul.mubr.f32.vlgmr.msra.gmra.mxu0 %v1593_v0  ;;  %1362 = vmatprep.subr.mxu1 %v1613_v53 }
 0x139   : > { %1363 = vmatpush3.msra.mxu1 %v2230_v56  ;;  %1364 = vmatprep.mubr.msk.f32.mxu1 %vm1614_vm2, %v1613_v53  ;;  %v2231_v53 = vld [vmem:[#allocation15_spill] sm:$0xff] }
 0x13a   : > { %1365 = vmatmul.mubr.f32.vlgmr.msra.gmra.mxu1 %v1593_v0 }
 0x1f8   : > { %v522_v62 = vpop.f32.mrf.mxu0 }
 0x1f9   : > { %v597_v50 = vadd.f32 %v522_v62, %v453_v1 }
 0x1fa   : > { %v593_v51 = vpop.f32.mrf.mxu1  ;;  %v524_v55 = vpop.f32.mrf.mxu0 }
 0x1fb   : > { %v1240_v59 = vmul.f32 -1.442695, %v597_v50  ;;  %v598_v63 = vadd.f32 %v524_v55, %v454_v52  ;;  %v611_v54 = vadd.f32 %v2231_v53, %v593_v51  ;;  %v674_v51 = vld [vmem:[#allocation7 + $0x168] sm:$0xff] (%p442_p1)  ;;  %v665_v53 = vld [vmem:[#allocation7 + $0x120] sm:$0xff] (%p442_p1) }
 0x1fc   : > { %v1366_v4 = vpop.f32.mrf.mxu1 }
 0x1fd   : > { %1491 = vpow2.f32 %v1240_v59  ;;  %v1241_v7 = vmul.f32 -1.442695, %v598_v63  ;;  %v672_v63 = vld [vmem:[#allocation7 + $0x158] sm:$0xff] (%p442_p1) }
 0x1ff   : > { %1493 = vpow2.f32 %v1241_v7  ;;  %v2232_v7 = vmov (%p442_p1), 0.0  }
 0x200   :  { %758 = vmatprep.mubr.f32.mxu0 (%p442_p1), %v2232_v7 }
 0x20a   : > { %v1492_v57 = vpop.eup %1491 }
 0x20b   : > { %v605_v58 = vadd.f32 1.0, %v1492_v57  ;;  %v671_v57 = vld [vmem:[#allocation7 + $0x150] sm:$0xff] (%p442_p1) }
 0x20c   : > { %v1494_v60 = vpop.eup %1493 }
 0x20d   : > { %1495 = vrcp.f32 %v605_v58  ;;  %v606_v61 = vadd.f32 1.0, %v1494_v60  ;;  %v669_v58 = vld [vmem:[#allocation7 + $0x140] sm:$0xff] (%p442_p1)  ;;  %v668_v60 = vld [vmem:[#allocation7 + $0x138] sm:$0xff] (%p442_p1) }
 0x20f   : > { %1497 = vrcp.f32 %v606_v61  ;;  %v666_v61 = vld [vmem:[#allocation7 + $0x128] sm:$0xff] (%p442_p1) }
 0x21a   : > { %v1496_v56 = vpop.eup %1495 }
 0x21b   : > { %v612_v1 = vmul.f32 %v1496_v56, %v611_v54  ;;  %v676_v54 = vld [vmem:[#allocation7 + $0x178] sm:$0xff] (%p442_p1)  ;;  %v673_v56 = vld [vmem:[#allocation7 + $0x160] sm:$0xff] (%p442_p1) }
 0x21c   : > { %v1498_v50 = vpop.eup %1497  ;;  %1367 = vmatprep.subr.mxu1 (%p442_p1), %v676_v54 }
 0x21d   : > { %v613_v62 = vadd.f32 %v612_v1, %v455_v2  ;;  %v615_v4 = vsub.f32 1.0, %v1498_v50  ;;  %v617_v52 = vmul.f32 %v1593_v0, %v1498_v50  ;;  %v675_v2 = vld [vmem:[#allocation7 + $0x170] sm:$0xff] (%p442_p1)  ;;  %1368 = vmatpush3.msra.mxu1 (%p442_p1), %v676_v54  ;;  %v1982_v1 = vld [vmem:[#allocation9] sm:$0xff] (%p442_p1) }
 0x21e   :  { %694 = vmatprep.subr.mxu0 (%p442_p1), %v675_v2  ;;  %1369 = vmatprep.subr.mxu1 (%p442_p1), %v673_v56  ;;  %2233 = vst [vmem:[#allocation12_spill] sm:$0xff] (%p442_p1), %v1982_v1  ;;  %v1986_v50 = vld [vmem:[#allocation9 + $0x10] sm:$0xff] (%p442_p1)  ;;  %v1996_v2 = vld [vmem:[#allocation9 + $0x38] sm:$0xff] (%p442_p1)  ;;  %v2014_v54 = vld [vmem:[#allocation9 + $0x80] sm:$0xff] (%p442_p1) }
 0x21f   : > { %1499 = vtanh.f32 %v613_v62  ;;  %695 = vmatpush1.msra.mxu0 (%p442_p1), %v674_v51  ;;  %1370 = vmatpush3.msra.mxu1 (%p442_p1), %v673_v56  ;;  %v1984_v62 = vld [vmem:[#allocation9 + $0x8] sm:$0xff] (%p442_p1)  ;;  %2234 = vst [vmem:[#allocation13_spill] sm:$0xff] (%p442_p1), %v1986_v50  ;;  %v1998_v51 = vld [vmem:[#allocation9 + $0x40] sm:$0xff] (%p442_p1)  ;;  %v2018_v56 = vld [vmem:[#allocation9 + $0x90] sm:$0xff] (%p442_p1) }
 0x220   :  { %696 = vmatprep.subr.mxu0 (%p442_p1), %v672_v63  ;;  %1371 = vmatprep.subr.mxu1 (%p442_p1), %v670_v5  ;;  %v2000_v63 = vld [vmem:[#allocation9 + $0x48] sm:$0xff] (%p442_p1) }
 0x221   :  { %697 = vmatpush1.msra.mxu0 (%p442_p1), %v671_v57  ;;  %1372 = vmatpush3.msra.mxu1 (%p442_p1), %v670_v5  ;;  %v2004_v57 = vld [vmem:[#allocation9 + $0x58] sm:$0xff] (%p442_p1)  ;;  %v2022_v5 = vld [vmem:[#allocation9 + $0xa0] sm:$0xff] (%p442_p1) }
 0x222   :  { %698 = vmatprep.subr.mxu0 (%p442_p1), %v669_v58  ;;  %1373 = vmatprep.subr.mxu1 (%p442_p1), %v667_v9  ;;  %v2006_v58 = vld [vmem:[#allocation9 + $0x60] sm:$0xff] (%p442_p1) }
 0x223   :  { %699 = vmatpush1.msra.mxu0 (%p442_p1), %v668_v60  ;;  %1374 = vmatpush3.msra.mxu1 (%p442_p1), %v667_v9  ;;  %v2008_v60 = vld [vmem:[#allocation9 + $0x68] sm:$0xff] (%p442_p1)  ;;  %v2028_v9 = vld [vmem:[#allocation9 + $0xb8] sm:$0xff] (%p442_p1) }
 0x224   :  { %700 = vmatprep.subr.mxu0 (%p442_p1), %v666_v61  ;;  %1375 = vmatprep.subr.mxu1 (%p442_p1), %v664_v12  ;;  %v2010_v61 = vld [vmem:[#allocation9 + $0x70] sm:$0xff] (%p442_p1) }
 0x225   :  { %701 = vmatpush1.msra.mxu0 (%p442_p1), %v665_v53  ;;  %1376 = vmatpush3.msra.mxu1 (%p442_p1), %v664_v12  ;;  %v2012_v53 = vld [vmem:[#allocation9 + $0x78] sm:$0xff] (%p442_p1)  ;;  %v2034_v12 = vld [vmem:[#allocation9 + $0xd0] sm:$0xff] (%p442_p1) }
 0x226   :  { %1377 = vmatprep.subr.mxu1 (%p442_p1), %v661_v15 }
 0x227   :  { %1378 = vmatpush3.msra.mxu1 (%p442_p1), %v661_v15  ;;  %v2040_v15 = vld [vmem:[#allocation9 + $0xe8] sm:$0xff] (%p442_p1) }
 0x228   :  { %1379 = vmatprep.subr.mxu1 (%p442_p1), %v658_v18 }
 0x229   :  { %1380 = vmatpush3.msra.mxu1 (%p442_p1), %v658_v18  ;;  %v2046_v18 = vld [vmem:[#allocation9 + $0x100] sm:$0xff] (%p442_p1) }
 0x22a   :  { %1381 = vmatprep.subr.mxu1 (%p442_p1), %v655_v21 }
 0x22b   :  { %1382 = vmatpush3.msra.mxu1 (%p442_p1), %v655_v21  ;;  %v2052_v21 = vld [vmem:[#allocation9 + $0x118] sm:$0xff] (%p442_p1) }
 0x22c   : > { %v1500_v59 = vpop.eup %1499  ;;  %1383 = vmatprep.subr.mxu1 (%p442_p1), %v652_v24 }
 0x22d   : > { %v616_v55 = vmul.f32 %v1500_v59, %v615_v4  ;;  %444 = sbr.rel (!%p442_p1) target bundleno = 280 (0x118), region = 93  ;;  %1384 = vmatpush3.msra.mxu1 (%p442_p1), %v652_v24  ;;  %v1988_v4 = vld [vmem:[#allocation9 + $0x18] sm:$0xff] (%p442_p1)  ;;  %v1990_v59 = vld [vmem:[#allocation9 + $0x20] sm:$0xff] (%p442_p1)  ;;  %v2058_v24 = vld [vmem:[#allocation9 + $0x130] sm:$0xff] (%p442_p1) }
 0x22e   :  { %1385 = vmatprep.subr.mxu1 (%p442_p1), %v649_v27 }
 0x22f   : > { %v618_v0 = vadd.f32 %v617_v52, %v616_v55   ;;  %1386 = vmatpush3.msra.mxu1 (%p442_p1), %v649_v27  ;;  %v1992_v52 = vld [vmem:[#allocation9 + $0x28] sm:$0xff] (%p442_p1)  ;;  %v1994_v55 = vld [vmem:[#allocation9 + $0x30] sm:$0xff] (%p442_p1) }
 0x230   :  { %1387 = vmatprep.subr.mxu1 (%p442_p1), %v646_v30  ;;  %2235 = vst [vmem:[#allocation14_spill] sm:$0xff] (%p442_p1), %v1992_v52  ;;  %v2064_v27 = vld [vmem:[#allocation9 + $0x148] sm:$0xff] (%p442_p1) }
 0x231   : > { %620 = vst [vmem:[%s619_s15] sm:$0xff] %v618_v0  ;;  %v663_v0 = vld [vmem:[#allocation7 + $0x110] sm:$0xff] (%p442_p1)  ;;  %1388 = vmatpush3.msra.mxu1 (%p442_p1), %v646_v30  ;;  %v2070_v30 = vld [vmem:[#allocation9 + $0x160] sm:$0xff] (%p442_p1) }
 0x232   :  { %702 = vmatprep.subr.mxu0 %v663_v0  ;;  %1389 = vmatprep.subr.mxu1 %v643_v33  ;;  %v2016_v0 = vld [vmem:[#allocation9 + $0x88] sm:$0xff] }
 0x233   :  { %703 = vmatpush1.msra.mxu0 %v662_v3  ;;  %1390 = vmatpush3.msra.mxu1 %v643_v33  ;;  %2236 = vst [vmem:[#allocation15_spill] sm:$0xff] %v2016_v0  ;;  %v2020_v3 = vld [vmem:[#allocation9 + $0x98] sm:$0xff] }
 0x234   :  { %704 = vmatprep.subr.mxu0 %v660_v6  ;;  %1391 = vmatprep.subr.mxu1 %v640_v36  ;;  %v2024_v6 = vld [vmem:[#allocation9 + $0xa8] sm:$0xff]  ;;  %v2076_v33 = vld [vmem:[#allocation9 + $0x178] sm:$0xff] }
 0x235   :  { %705 = vmatpush1.msra.mxu0 %v659_v8  ;;  %1392 = vmatpush3.msra.mxu1 %v640_v36  ;;  %v2026_v8 = vld [vmem:[#allocation9 + $0xb0] sm:$0xff]  ;;  %v2238_v36 = vld [vmem:[#allocation16_spill] sm:$0xff] }
 0x236   :  { %706 = vmatprep.subr.mxu0 %v657_v10  ;;  %1393 = vmatprep.subr.mxu1 %v637_v39  ;;  %v2030_v10 = vld [vmem:[#allocation9 + $0xc0] sm:$0xff] }
 0x237   :  { %707 = vmatpush1.msra.mxu0 %v656_v11  ;;  %1394 = vmatpush3.msra.mxu1 %v637_v39  ;;  %v2032_v11 = vld [vmem:[#allocation9 + $0xc8] sm:$0xff]  ;;  %v2240_v39 = vsub.s32 1, %v2238_v36 }
 0x238   :  { %708 = vmatprep.subr.mxu0 %v654_v13  ;;  %v621_v40 = vld [vmem:[#allocation3] sm:$0xff]  ;;  %v622_v43 = vld [vmem:[#allocation3 + $0x8] sm:$0xff]  ;;  %1395 = vmatprep.subr.mxu1 %v634_v41  ;;  %v623_v44 = vld [vmem:[#allocation3 + $0x10] sm:$0xff] }
 0x239   :  { %709 = vmatpush1.msra.mxu0 %v653_v14  ;;  %1396 = vmatpush3.msra.mxu1 %v634_v41  ;;  %v624_v45 = vld [vmem:[#allocation3 + $0x18] sm:$0xff]  ;;  %v625_v46 = vld [vmem:[#allocation3 + $0x20] sm:$0xff]  ;;  %v627_v47 = vld [vmem:[#allocation3 + $0x30] sm:$0xff] }
 0x23a   :  { %710 = vmatprep.subr.mxu0 %v651_v16  ;;  %1399 = vmatprep.mubr.f32.mxu1 %v621_v40  ;;  %v626_v48 = vld [vmem:[#allocation3 + $0x28] sm:$0xff]  ;;  %v628_v49 = vld [vmem:[#allocation3 + $0x38] sm:$0xff] }
 0x23b   :  { %711 = vmatpush1.msra.mxu0 %v650_v17  ;;  %1397 = vmatprep.subr.mxu1 %v631_v42  ;;  %v2036_v13 = vld [vmem:[#allocation9 + $0xd8] sm:$0xff]  ;;  %v2038_v14 = vld [vmem:[#allocation9 + $0xe0] sm:$0xff]  ;;  %v2042_v16 = vld [vmem:[#allocation9 + $0xf0] sm:$0xff] }
 0x23c   :  { %712 = vmatprep.subr.mxu0 %v648_v19  ;;  %1398 = vmatpush3.msra.mxu1 %v631_v42  ;;  %v2044_v17 = vld [vmem:[#allocation9 + $0xf8] sm:$0xff]  ;;  %v2048_v19 = vld [vmem:[#allocation9 + $0x108] sm:$0xff] }
 0x23d   :  { %713 = vmatpush1.msra.mxu0 %v647_v20  ;;  %1400 = vmatmul.mubr.f32.vlgmr.msra.gmra.mxu1 %v622_v43  ;;  %v2050_v20 = vld [vmem:[#allocation9 + $0x110] sm:$0xff] }
 0x23e   :  { %714 = vmatprep.subr.mxu0 %v645_v22  ;;  %1402 = vmatprep.mubr.f32.mxu1 %v623_v44  ;;  %v2054_v22 = vld [vmem:[#allocation9 + $0x120] sm:$0xff] }
 0x23f   :  { %715 = vmatpush1.msra.mxu0 %v644_v23  ;;  %v2056_v23 = vld [vmem:[#allocation9 + $0x128] sm:$0xff] }
 0x240   :  { %716 = vmatprep.subr.mxu0 %v642_v25  ;;  %v2060_v25 = vld [vmem:[#allocation9 + $0x138] sm:$0xff] }
 0x241   :  { %717 = vmatpush1.msra.mxu0 %v641_v26  ;;  %1403 = vmatmul.mubr.f32.gmra.mxu1 %v624_v45  ;;  %v2062_v26 = vld [vmem:[#allocation9 + $0x140] sm:$0xff] }
 0x242   :  { %718 = vmatprep.subr.mxu0 %v639_v28  ;;  %1405 = vmatprep.mubr.f32.mxu1 %v625_v46  ;;  %v2066_v28 = vld [vmem:[#allocation9 + $0x150] sm:$0xff] }
 0x243   :  { %719 = vmatpush1.msra.mxu0 %v638_v29  ;;  %v2068_v29 = vld [vmem:[#allocation9 + $0x158] sm:$0xff] }
 0x244   :  { %720 = vmatprep.subr.mxu0 %v636_v31  ;;  %v2072_v31 = vld [vmem:[#allocation9 + $0x168] sm:$0xff] }
 0x245   :  { %721 = vmatpush1.msra.mxu0 %v635_v32  ;;  %1406 = vmatmul.mubr.f32.gmra.mxu1 %v626_v48  ;;  %v2074_v32 = vld [vmem:[#allocation9 + $0x170] sm:$0xff] }
 0x246   :  { %722 = vmatprep.subr.mxu0 %v633_v34  ;;  %1408 = vmatprep.mubr.f32.mxu1 %v627_v47  ;;  %v2081_v34 = vld [vmem:[%s2212_s8] ss:$0 sm:$0xff] }
 0x247   :  { %723 = vmatpush1.msra.mxu0 %v632_v35  ;;  %2237 = vst [vmem:[#allocation17_spill] sm:$0xff] %v2081_v34  ;;  %v677_v35 = vld [vmem:[%s2211_s7] sm:$0x7]  ;;  %s2114_s7 = smov 0  }
 0x248   :  { %724 = vmatprep.subr.mxu0 %v630_v37  ;;  %v2239_v37 = vsub.s32 0, %v2238_v36 }
 0x249   :  { %725 = vmatpush1.msra.mxu0 %v629_v38  ;;  %1409 = vmatmul.mubr.f32.gmra.mxu1 %v628_v49 }
 0x24a   :  { %759 = vmatmul.mubr.f32.vlgmr.msra.gmra.mxu0 %v621_v40  ;;  %v2088_v38 = vrot.slane %v677_v35, %v2239_v37  ;;  %v2092_v40 = vrot.slane %v677_v35, %v2240_v39 }
 0x24b   :  { %764 = vmatprep.mubr.f32.mxu0 %v2232_v7 }
 0x24e   :  { %765 = vmatmul.mubr.f32.gmra.mxu0 %v622_v43 }
 0x24f   :  { %770 = vmatprep.mubr.f32.mxu0 %v2232_v7 }
 0x252   :  { %771 = vmatmul.mubr.f32.gmra.mxu0 %v623_v44  ;;  %v2241_v44 = vsub.s32 2, %v2238_v36 }
 0x253   :  { %776 = vmatprep.mubr.f32.mxu0 %v2232_v7 }
 0x256   :  { %777 = vmatmul.mubr.f32.gmra.mxu0 %v624_v45  ;;  %v690_v45 = vrot.slane %v677_v35, %v2241_v44 }
 0x257   :  { %782 = vmatprep.mubr.f32.mxu0 %v2232_v7 }
 0x25a   :  { %783 = vmatmul.mubr.f32.gmra.mxu0 %v625_v46 }
 0x25b   :  { %788 = vmatprep.mubr.f32.mxu0 %v2232_v7 }
 0x25e   :  { %789 = vmatmul.mubr.f32.gmra.mxu0 %v626_v48 }
 0x25f   :  { %794 = vmatprep.mubr.f32.mxu0 %v2232_v7 }
 0x262   :  { %795 = vmatmul.mubr.f32.gmra.mxu0 %v627_v47 }
 0x263   :  { %800 = vmatprep.mubr.f32.mxu0 %v2232_v7  ;;  %v2002_v7 = vld [vmem:[#allocation9 + $0x50] sm:$0xff] }
 0x266   :  { %801 = vmatmul.mubr.f32.gmra.mxu0 %v628_v49 }
 0x2fd   :  { %v1401_v49 = vpop.f32.mrf.mxu1 }
 0x2fe   :  { %v879_v34 = vadd.f32 %v1401_v49, %v690_v45 }
 0x2ff   :  { %v873_v50 = vpop.f32.mrf.mxu1 }
 0x300   :  { %917 = vst [vmem:[#allocation2 + $0x28] sm:$0xff] %v879_v34 }
 0x301   :  { %v1404_v36 = vpop.f32.mrf.mxu1 }
 0x30a   :  { %v760_v41 = vpop.f32.mrf.mxu0 }
 0x30b   :  { %v761_v42 = vadd.f32 %v760_v41, %v2088_v38  ;;  %v874_v41 = vadd.f32 %v873_v50, %v690_v45 }
 0x30c   :  { %v762_v43 = vpop.f32.mrf.mxu0 }
 0x30d   :  { %912 = vst [vmem:[#allocation2] sm:$0xff] %v761_v42  ;;  %v763_v46 = vadd.f32 %v762_v43, %v2092_v40  ;;  %914 = vst [vmem:[#allocation2 + $0x10] sm:$0xff] %v874_v41  ;;  %v889_v43 = vadd.f32 %v1404_v36, %v690_v45 }
 0x30e   :  { %v766_v47 = vpop.f32.mrf.mxu0 }
 0x30f   :  { %913 = vst [vmem:[#allocation2 + $0x8] sm:$0xff] %v763_v46  ;;  %v767_v48 = vadd.f32 %v766_v47, %v2088_v38  ;;  %v883_v46 = vpop.f32.mrf.mxu1  ;;  %923 = vst [vmem:[#allocation2 + $0x58] sm:$0xff] %v889_v43 }
 0x310   :  { %v768_v37 = vpop.f32.mrf.mxu0 }
 0x311   :  { %915 = vst [vmem:[#allocation2 + $0x18] sm:$0xff] %v767_v48  ;;  %v769_v39 = vadd.f32 %v768_v37, %v2092_v40  ;;  %v884_v48 = vadd.f32 %v883_v46, %v690_v45  ;;  %v1407_v37 = vpop.f32.mrf.mxu1 }
 0x312   :  { %v772_v52 = vpop.f32.mrf.mxu0  ;;  %v899_v50 = vadd.f32 %v1407_v37, %v690_v45 }
 0x313   :  { %916 = vst [vmem:[#allocation2 + $0x20] sm:$0xff] %v769_v39  ;;  %v773_v35 = vadd.f32 %v772_v52, %v2088_v38  ;;  %920 = vst [vmem:[#allocation2 + $0x40] sm:$0xff] %v884_v48  ;;  %v893_v39 = vpop.f32.mrf.mxu1 }
 0x314   :  { %v774_v42 = vpop.f32.mrf.mxu0  ;;  %929 = vst [vmem:[#allocation2 + $0x88] sm:$0xff] %v899_v50 }
 0x315   :  { %918 = vst [vmem:[#allocation2 + $0x30] sm:$0xff] %v773_v35  ;;  %v775_v44 = vadd.f32 %v774_v42, %v2092_v40  ;;  %v894_v35 = vadd.f32 %v893_v39, %v690_v45  ;;  %v1410_v42 = vpop.f32.mrf.mxu1 }
 0x316   :  { %v778_v47 = vpop.f32.mrf.mxu0 }
 0x317   :  { %919 = vst [vmem:[#allocation2 + $0x38] sm:$0xff] %v775_v44  ;;  %v779_v49 = vadd.f32 %v778_v47, %v2088_v38  ;;  %926 = vst [vmem:[#allocation2 + $0x70] sm:$0xff] %v894_v35  ;;  %v909_v44 = vadd.f32 %v1410_v42, %v690_v45  ;;  %v903_v47 = vpop.f32.mrf.mxu1 }
 0x318   :  { %v780_v34 = vpop.f32.mrf.mxu0 }
 0x319   :  { %921 = vst [vmem:[#allocation2 + $0x48] sm:$0xff] %v779_v49  ;;  %v781_v52 = vadd.f32 %v780_v34, %v2092_v40  ;;  %935 = vst [vmem:[#allocation2 + $0xb8] sm:$0xff] %v909_v44  ;;  %v904_v49 = vadd.f32 %v903_v47, %v690_v45  ;;  %v2112_v44 = vmov 0.0  }
 0x31a   :  { %v784_v41 = vpop.f32.mrf.mxu0 }
 0x31b   :  { %922 = vst [vmem:[#allocation2 + $0x50] sm:$0xff] %v781_v52  ;;  %v785_v36 = vadd.f32 %v784_v41, %v2088_v38  ;;  %932 = vst [vmem:[#allocation2 + $0xa0] sm:$0xff] %v904_v49 }
 0x31c   :  { %v786_v43 = vpop.f32.mrf.mxu0 }
 0x31d   :  { %924 = vst [vmem:[#allocation2 + $0x60] sm:$0xff] %v785_v36  ;;  %v787_v46 = vadd.f32 %v786_v43, %v2092_v40 }
 0x31e   :  { %v790_v48 = vpop.f32.mrf.mxu0 }
 0x31f   :  { %925 = vst [vmem:[#allocation2 + $0x68] sm:$0xff] %v787_v46  ;;  %v791_v37 = vadd.f32 %v790_v48, %v2088_v38 }
 0x320   :  { %v792_v34 = vpop.f32.mrf.mxu0 }
 0x321   :  { %927 = vst [vmem:[#allocation2 + $0x78] sm:$0xff] %v791_v37  ;;  %v793_v50 = vadd.f32 %v792_v34, %v2092_v40 }
 0x322   :  { %v796_v52 = vpop.f32.mrf.mxu0 }
 0x323   :  { %928 = vst [vmem:[#allocation2 + $0x80] sm:$0xff] %v793_v50  ;;  %v797_v39 = vadd.f32 %v796_v52, %v2088_v38 }
 0x324   :  { %v798_v41 = vpop.f32.mrf.mxu0 }
 0x325   :  { %930 = vst [vmem:[#allocation2 + $0x90] sm:$0xff] %v797_v39  ;;  %v799_v35 = vadd.f32 %v798_v41, %v2092_v40 }
 0x326   :  { %v802_v36 = vpop.f32.mrf.mxu0 }
 0x327   :  { %931 = vst [vmem:[#allocation2 + $0x98] sm:$0xff] %v799_v35  ;;  %v803_v45 = vadd.f32 %v802_v36, %v2088_v38 }
 0x328   :  { %v804_v42 = vpop.f32.mrf.mxu0 }
 0x329   :  { %933 = vst [vmem:[#allocation2 + $0xa8] sm:$0xff] %v803_v45  ;;  %v805_v43 = vadd.f32 %v804_v42, %v2092_v40 }
 0x32b   :  { %934 = vst [vmem:[#allocation2 + $0xb0] sm:$0xff] %v805_v43 }
 0x32c LB: > { %1007 = vmatprep.subr.mxu0 %v2074_v32  ;;  %v1615_v38 = vmov 0.0   ;;  %v2242_v0 = vld [vmem:[#allocation15_spill] sm:$0xff]  ;;  %v2243_v1 = vld [vmem:[#allocation12_spill] sm:$0xff]  ;;  %v2244_v40 = vld [vmem:[#allocation14_spill] sm:$0xff]  ;;  %vm1616_vm3 = vmmov 0   ;;  %s1243_s8 = sshll.u32 %s1605_s7, 3  ;;  %s1605_s7 = sphi %s2114_s7, %s996_s7   ;;  %v1601_v44 = vphi %v2112_v44, %v2247_v44  }
 0x32d   : > { %1008 = vmatpush1.msra.mxu0 %v2072_v31  ;;  %1411 = vmatprep.subr.mxu1 %v1615_v38  ;;  %v2245_v46 = vld [vmem:[#allocation13_spill] sm:$0xff]  ;;  %s999_s20 = sshra.s32 %s1243_s8, 3  ;;  %s996_s7 = sadd.s32 1, %s1605_s7  }
 0x32e   : > { %1009 = vmatprep.subr.mxu0 %v2068_v29  ;;  %1071 = vmatprep.mubr.f32.mxu0 %v1615_v38  ;;  %s1250_s4 = smul.u32 24, %s999_s20  ;;  %p993_p2 = scmp.ge.s32.totalorder %s996_s7, 8  }
 0x32f   : > { %1010 = vmatpush1.msra.mxu0 %v2066_v28  ;;  %1412 = vmatpush3.msra.mxu1 %v2076_v33  ;;  %vm1188_vm4 = vcmask (%p993_p2), 7168  }
 0x330   : > { %1011 = vmatprep.subr.mxu0 %v2062_v26  ;;  %1413 = vmatprep.subr.mxu1 %v1615_v38  ;;  %s1003_s21 = scalar_lea.vmem [#allocation2], %s1250_s4 }
 0x331   : > { %1012 = vmatpush1.msra.mxu0 %v2060_v25  ;;  %1414 = vmatpush3.msra.mxu1 %v2070_v30 }
 0x332   : > { %1013 = vmatprep.subr.mxu0 %v2056_v23  ;;  %1415 = vmatprep.subr.mxu1 %v1615_v38  ;;  %v1004_v47 = vld [vmem:[%s1003_s21] sm:$0xff]  ;;  %v1005_v50 = vld [vmem:[%s1003_s21 + $0x8] sm:$0xff] }
 0x333   : > { %1014 = vmatpush1.msra.mxu0 %v2054_v22  ;;  %1416 = vmatpush3.msra.mxu1 %v2064_v27 }
 0x334   : > { %1015 = vmatprep.subr.mxu0 %v2050_v20  ;;  %1417 = vmatprep.subr.mxu1 %v1615_v38 }
 0x335   : > { %1016 = vmatpush1.msra.mxu0 %v2048_v19  ;;  %1418 = vmatpush3.msra.mxu1 %v2058_v24 }
 0x336   : > { %1017 = vmatprep.subr.mxu0 %v2044_v17  ;;  %1419 = vmatprep.subr.mxu1 %v1615_v38 }
 0x337   : > { %1018 = vmatpush1.msra.mxu0 %v2042_v16  ;;  %1420 = vmatpush3.msra.mxu1 %v2052_v21 }
 0x338   : > { %1019 = vmatprep.subr.mxu0 %v2038_v14  ;;  %1421 = vmatprep.subr.mxu1 %v1615_v38 }
 0x339   : > { %1020 = vmatpush1.msra.mxu0 %v2036_v13  ;;  %1422 = vmatpush3.msra.mxu1 %v2046_v18 }
 0x33a   : > { %1021 = vmatprep.subr.mxu0 %v2032_v11  ;;  %1423 = vmatprep.subr.mxu1 %v1615_v38 }
 0x33b   : > { %1022 = vmatpush1.msra.mxu0 %v2030_v10  ;;  %1424 = vmatpush3.msra.mxu1 %v2040_v15 }
 0x33c   : > { %1023 = vmatprep.subr.mxu0 %v2026_v8  ;;  %1425 = vmatprep.subr.mxu1 %v1615_v38 }
 0x33d   : > { %1024 = vmatpush1.msra.mxu0 %v2024_v6  ;;  %1426 = vmatpush3.msra.mxu1 %v2034_v12 }
 0x33e   : > { %1025 = vmatprep.subr.mxu0 %v2020_v3  ;;  %1427 = vmatprep.subr.mxu1 %v1615_v38 }
 0x33f   : > { %1026 = vmatpush1.msra.mxu0 %v2018_v56  ;;  %1428 = vmatpush3.msra.mxu1 %v2028_v9 }
 0x340   : > { %1027 = vmatprep.subr.mxu0 %v2014_v54  ;;  %1429 = vmatprep.subr.mxu1 %v1615_v38 }
 0x341   : > { %1028 = vmatpush1.msra.mxu0 %v2012_v53  ;;  %1430 = vmatpush3.msra.mxu1 %v2022_v5 }
 0x342   : > { %1029 = vmatprep.subr.mxu0 %v2008_v60  ;;  %1431 = vmatprep.subr.mxu1 %v1615_v38 }
 0x343   : > { %1030 = vmatpush1.msra.mxu0 %v2006_v58  ;;  %1432 = vmatpush3.msra.mxu1 %v2242_v0  ;;  %v1006_v0 = vld [vmem:[%s1003_s21 + $0x10] sm:$0xff] }
 0x344   : > { %1031 = vmatprep.subr.mxu0 %v2002_v7  ;;  %1433 = vmatprep.subr.mxu1 %v1615_v38 }
 0x345   : > { %1032 = vmatpush1.msra.mxu0 %v2000_v63  ;;  %1434 = vmatpush3.msra.mxu1 %v2010_v61 }
 0x346   : > { %1033 = vmatprep.subr.mxu0 %v1996_v2  ;;  %1435 = vmatprep.subr.mxu1 %v1615_v38 }
 0x347   : > { %1034 = vmatpush1.msra.mxu0 %v1994_v55  ;;  %1436 = vmatpush3.msra.mxu1 %v2004_v57 }
 0x348   : > { %1035 = vmatprep.subr.mxu0 %v1990_v59  ;;  %1437 = vmatprep.subr.mxu1 %v1615_v38 }
 0x349   : > { %1036 = vmatpush1.msra.mxu0 %v1988_v4  ;;  %1438 = vmatpush3.msra.mxu1 %v1998_v51 }
 0x34a   : > { %1037 = vmatprep.subr.mxu0 %v1984_v62  ;;  %1439 = vmatprep.subr.mxu1 %v1615_v38 }
 0x34b   : > { %1038 = vmatpush1.msra.mxu0 %v2243_v1  ;;  %1440 = vmatpush3.msra.mxu1 %v2244_v40 }
 0x34c   : > { %1072 = vmatmul.mubr.f32.vlgmr.msra.gmra.mxu0 %v1601_v44  ;;  %1441 = vmatprep.subr.mxu1 %v1615_v38 }
 0x34d   : > { %1442 = vmatpush3.msra.mxu1 %v2245_v46  ;;  %1443 = vmatprep.mubr.msk.f32.mxu1 %vm1616_vm3, %v1615_v38  ;;  %v2246_v38 = vld [vmem:[#allocation17_spill] sm:$0xff] }
 0x34e   : > { %1444 = vmatmul.mubr.f32.vlgmr.msra.gmra.mxu1 %v1601_v44 }
 0x40c   : > { %v1073_v48 = vpop.f32.mrf.mxu0 }
 0x40d   : > { %v1148_v49 = vadd.f32 %v1073_v48, %v1004_v47 }
 0x40e   : > { %v1144_v37 = vpop.f32.mrf.mxu1  ;;  %v1075_v52 = vpop.f32.mrf.mxu0 }
 0x40f   : > { %v1245_v34 = vmul.f32 -1.442695, %v1148_v49  ;;  %v1149_v41 = vadd.f32 %v1075_v52, %v1005_v50  ;;  %v1162_v40 = vadd.f32 %v2246_v38, %v1144_v37 }
 0x410   : > { %v1445_v39 = vpop.f32.mrf.mxu1 }
 0x411   : > { %1501 = vpow2.f32 %v1245_v34  ;;  %v1246_v35 = vmul.f32 -1.442695, %v1149_v41  ;;  %v1248_v41 = vld [vmem:[#allocation4] ss:$0 sm:$0xff] (%p993_p2) }
 0x413   : > { %1503 = vpow2.f32 %v1246_v35 }
 0x41e   : > { %v1502_v36 = vpop.eup %1501 }
 0x41f   : > { %v1156_v45 = vadd.f32 1.0, %v1502_v36 }
 0x420   : > { %v1504_v42 = vpop.eup %1503 }
 0x421   : > { %1505 = vrcp.f32 %v1156_v45  ;;  %v1157_v43 = vadd.f32 1.0, %v1504_v42 }
 0x423   : > { %1507 = vrcp.f32 %v1157_v43 }
 0x42e   : > { %v1506_v46 = vpop.eup %1505 }
 0x42f   : > { %v1163_v47 = vmul.f32 %v1506_v46, %v1162_v40 }
 0x430   : > { %v1508_v49 = vpop.eup %1507 }
 0x431   : > { %v1164_v48 = vadd.f32 %v1163_v47, %v1006_v0  ;;  %v1166_v1 = vsub.f32 1.0, %v1508_v49  ;;  %v1168_v34 = vmul.f32 %v1601_v44, %v1508_v49  ;;  %v1247_v0 = vld [vmem:[%s2213_s9] ss:$0 sm:$0xff] (%p993_p2) }
 0x433   : > { %1509 = vtanh.f32 %v1164_v48 }
 0x440   : > { %v1510_v39 = vpop.eup %1509 }
 0x441   : > { %v1167_v50 = vmul.f32 %v1510_v39, %v1166_v1  ;;  %995 = sbr.rel (!%p993_p2) target bundleno = 812 (0x32c), region = 104 }
 0x443   : > { %v1169_v52 = vadd.f32 %v1168_v34, %v1167_v50  }
 0x445   : > { %v2247_v44 = vmov %v1169_v52  ;;  %v1177_v37 = vmul.f32 (%p993_p2), %v1247_v0, %v1169_v52 }
 0x447   :  { %1178 = vadd.xlane.f32.xlu0 %v1177_v37 }
 0x4d0   :  { %v1179_v35 = vpop.xlane.xlu0 %1178 }
 0x4d1   :  { %v1187_v44 = vadd.f32 %v1248_v41, %v1179_v35 }
 0x4d3   :  { %1189 = vst.msk [vmem:[%s2215_s11] sm:$0xff] %vm1188_vm4, %v1187_v44 }
 0x4d4   :  { %1194 = vsyncpa [#allocation6], 1 }
 0x4d5   :  { %1195 = vsyncpa [#allocation8], 1 }

</bundles_post_ra>
